<compile_context>
chip_gen: v5e
topology: v5e:2x2
jax: 0.10.0
libtpu: 0.0.40
codegen_flags: <defaults>
</compile_context>

<pallas_src>
import jax
import jax.numpy as jnp
from jax.experimental import pallas as pl
from jax.experimental.pallas import tpu as pltpu


_GROUP = 128                    # batch rows packed per 128-lane output row (fast path)
_TILE_BUDGET_BYTES = 12 << 20   # VMEM budget per pipeline buffer (x tile + out tile)
_VMEM_MARGIN_BYTES = 8 << 20    # slack for weights-double-buffer / Mosaic scratch


def _round_up(n, m):
    return ((n + m - 1) // m) * m


def _pick_tile(num_rows, row_vmem_bytes, budget_bytes=_TILE_BUDGET_BYTES):
    """Rows per grid step.

    * as large as the per-buffer VMEM budget allows (amortize per-step cost),
    * a multiple of 8 (f32 sublane tile) unless the block covers the full axis,
    * never larger than the axis (block == full axis is always legal),
    * split >= 2 ways when it would otherwise be a single step, so the
      "parallel" grid axis can feed both TensorCores on v7x.
    """
    if num_rows <= 8:
        return num_rows
    budget_rows = max(8, (budget_bytes // row_vmem_bytes) // 8 * 8)
    two_step = _round_up(-(-num_rows // 2), 8)          # cdiv(num_rows, 2) -> mult of 8
    tile = min(budget_rows, two_step, (num_rows // 8) * 8)
    return max(8, tile)


def _linear_sigmoid_kernel(x_ref, w_ref, b_ref, o_ref):
    # x_ref: [tile, K] (VMEM), w_ref: [K, N] (VMEM), b_ref: [1, 1] (SMEM).
    # The reduction runs on the otherwise-idle MXU so VPU/XLU slots stay free
    # and the kernel remains purely HBM-bandwidth bound.
    y = jnp.dot(x_ref[...], w_ref[...], preferred_element_type=jnp.float32)
    o_ref[...] = jax.nn.sigmoid(y + b_ref[0, 0]).astype(o_ref.dtype)


def _forward_packed(x, w_row, b):
    """Fast path (B % 128 == 0, F <= 64): fully lane-dense in and out."""
    B, F = x.shape
    Bg = B // _GROUP
    C = _GROUP * F
    xr = x.reshape(Bg, C)                                 # free contiguous reshape
    # W[j*F + f, j] = w[f], zero elsewhere (block diagonal): the matmul both
    # reduces over F and routes packed row j to output lane j.
    w_big = jnp.kron(jnp.eye(_GROUP, dtype=jnp.float32), w_row.reshape(F, 1))

    row_bytes = (C + _GROUP) * 4                          # x row + out row per buffer
    tile = _pick_tile(Bg, row_bytes)
    grid = (pl.cdiv(Bg, tile),)
    w_bytes = C * _GROUP * 4
    vmem_limit = 2 * tile * row_bytes + 2 * w_bytes + _VMEM_MARGIN_BYTES

    out = pl.pallas_call(
        _linear_sigmoid_kernel,
        out_shape=jax.ShapeDtypeStruct((Bg, _GROUP), jnp.float32),
        grid_spec=pltpu.PrefetchScalarGridSpec(
            num_scalar_prefetch=0,
            grid=grid,
            in_specs=[
                pl.BlockSpec((tile, C), lambda i: (i, 0)),     # streamed x tiles
                pl.BlockSpec((C, _GROUP), lambda i: (0, 0)),   # weight, VMEM resident
                pl.BlockSpec(memory_space=pltpu.SMEM),         # bias scalar
            ],
            out_specs=pl.BlockSpec((tile, _GROUP), lambda i: (i, 0)),
        ),
        compiler_params=pltpu.CompilerParams(
            dimension_semantics=("parallel",),
            vmem_limit_bytes=int(vmem_limit),
        ),
        cost_estimate=pl.CostEstimate(
            flops=2 * B * F,
            transcendentals=B,
            bytes_accessed=B * F * 4 + B * 4 + w_bytes),
    )(xr, w_big, b)
    return out.reshape(B, 1)                               # free contiguous reshape


def _forward_rowwise(x, w_row, b):
    """General path (any B, any F): one output row per batch row.

    The ragged last block is handled by the pipeline itself (input reads past
    the end of x land in unused buffer rows, output writes past the end are
    clipped), so no jnp.pad / extra HBM pass over x is needed.
    """
    B, F = x.shape
    lane_f = _round_up(F, 128)                             # VMEM lane padding of x rows
    row_bytes = (lane_f + 128) * 4                         # x row + (tile,1) out row
    tile = _pick_tile(B, row_bytes)
    grid = (pl.cdiv(B, tile),)
    w_bytes = _round_up(F, 8) * 128 * 4
    vmem_limit = 2 * tile * row_bytes + 2 * w_bytes + _VMEM_MARGIN_BYTES
    # TODO(synk): for extremely wide F (x row alone near the VMEM budget) add a
    # feature-reduction grid axis ("arbitrary") with a VMEM f32 accumulator.

    out = pl.pallas_call(
        _linear_sigmoid_kernel,
        out_shape=jax.ShapeDtypeStruct((B, 1), jnp.float32),
        grid_spec=pltpu.PrefetchScalarGridSpec(
            num_scalar_prefetch=0,
            grid=grid,
            in_specs=[
                pl.BlockSpec((tile, F), lambda i: (i, 0)),     # streamed x tiles
                pl.BlockSpec((F, 1), lambda i: (0, 0)),        # weight column, resident
                pl.BlockSpec(memory_space=pltpu.SMEM),         # bias scalar
            ],
            out_specs=pl.BlockSpec((tile, 1), lambda i: (i, 0)),
        ),
        compiler_params=pltpu.CompilerParams(
            dimension_semantics=("parallel",),
            vmem_limit_bytes=int(vmem_limit),
        ),
        cost_estimate=pl.CostEstimate(
            flops=2 * B * F,
            transcendentals=B,
            bytes_accessed=B * F * 4 + B * 4 + F * 4),
    )(x, w_row.reshape(F, 1), b)
    return out


def custom_model2_forward(x, weight, bias):
    """x: [B, F] float32; weight: [1, F] (PyTorch nn.Linear layout); bias: [1]."""
    B, F = x.shape
    x = x.astype(jnp.float32)
    w = weight.astype(jnp.float32)
    b = bias.reshape(1, 1).astype(jnp.float32)
    # Lane-dense packed path needs a free reshape (B % 128 == 0) and a small
    # block-diagonal weight (128*F x 128 f32 <= 4 MiB  <=>  F <= 64).
    if B >= _GROUP and B % _GROUP == 0 and F <= 64:
        return _forward_packed(x, w, b)
    # TODO(synk): for large B with B % 128 != 0, split into a packed main part
    # plus a tiny row-wise tail instead of falling back entirely.
    return _forward_rowwise(x, w, b)


if __name__ == "__main__":
    key = jax.random.PRNGKey(0)
    k_x, k_w, k_b = jax.random.split(key, 3)

    in_features = 32
    bound = 1.0 / (in_features ** 0.5)

    # Round test data to bf16-representable values so the MXU matmul (whatever
    # f32 pass decomposition the backend picks) matches the pure-JAX reference
    # to f32 accumulation error; keeps the check tight at 1e-5.
    def _q(v):
        return v.astype(jnp.bfloat16).astype(jnp.float32)

    weight = _q(jax.random.uniform(
        k_w, (1, in_features), minval=-bound, maxval=bound, dtype=jnp.float32))
    bias = _q(jax.random.uniform(
        k_b, (1,), minval=-bound, maxval=bound, dtype=jnp.float32))

    def reference(xv):
        return jax.nn.sigmoid(xv @ weight.T + bias)

    # batch=256 -> packed lane-dense MXU path (B % 128 == 0)
    # batch=8   -> generic row-wise path, single full-array block
    # batch=37  -> generic row-wise path with an un-padded ragged last block
    for batch in (256, 8, 37):
        kx = jax.random.fold_in(k_x, batch)
        x = _q(jax.random.normal(kx, (batch, in_features), dtype=jnp.float32))
        out = custom_model2_forward(x, weight, bias)
        jax.block_until_ready(out)
        assert out.shape == (batch, 1), out.shape
        ref = reference(x)
        assert jnp.allclose(out, ref, atol=1e-5, rtol=1e-5), (
            f"mismatch vs reference at batch={batch}: "
            f"max abs err {jnp.max(jnp.abs(out - ref))}")

    print("KERNEL_OK")
</pallas_src>

<mosaic_0001>
module attributes {stable_mosaic.version = 11 : i64} {
  func.func @_linear_sigmoid_kernel(%arg0: i32, %arg1: memref<2x4096xf32, #tpu.memory_space<vmem>>, %arg2: memref<4096x128xf32, #tpu.memory_space<vmem>>, %arg3: memref<1x1xf32, #tpu.memory_space<smem>>, %arg4: memref<2x128xf32, #tpu.memory_space<vmem>>) attributes {dimension_semantics = [#tpu.dimension_semantics<parallel>], iteration_bounds = array<i64: 1>, scalar_prefetch = 0 : i64, scratch_operands = 0 : i64, tpu.core_type = #tpu.core_type<tc>, window_params = [{transform_indices = @transform_0, window_bounds = array<i64: 2, 4096>}, {pipeline_mode = #tpu.pipeline_mode<synchronous>, transform_indices = @transform_1, window_bounds = array<i64: 4096, 128>}, {transform_indices = @transform_2, window_bounds = array<i64: 1, 1>}, {transform_indices = @transform_3, window_bounds = array<i64: 2, 128>}]} {
    %c0 = arith.constant 0 : index
    %c0_0 = arith.constant 0 : index
    %0 = vector.load %arg1[%c0, %c0_0] : memref<2x4096xf32, #tpu.memory_space<vmem>>, vector<2x4096xf32>
    %c0_1 = arith.constant 0 : index
    %c0_2 = arith.constant 0 : index
    %1 = vector.load %arg2[%c0_1, %c0_2] : memref<4096x128xf32, #tpu.memory_space<vmem>>, vector<4096x128xf32>
    %cst = arith.constant dense<0.000000e+00> : vector<2x128xf32>
    %2 = tpu.matmul %0, %1, %cst {dimension_numbers = #tpu.dot_dimension_numbers<[1], [0], [0], [1], [0, 0, 1, 1], [], []>} : vector<2x4096xf32>, vector<4096x128xf32>, vector<2x128xf32> -> vector<2x128xf32>
    %c0_3 = arith.constant 0 : index
    %c0_4 = arith.constant 0 : index
    %3 = memref.load %arg3[%c0_3, %c0_4] : memref<1x1xf32, #tpu.memory_space<smem>>
    %4 = vector.broadcast %3 : f32 to vector<2x128xf32>
    %5 = arith.addf %2, %4 : vector<2x128xf32>
    %6 = arith.negf %5 : vector<2x128xf32>
    %7 = math.exp %6 : vector<2x128xf32>
    %cst_5 = arith.constant 1.000000e+00 : f32
    %8 = vector.broadcast %cst_5 : f32 to vector<2x128xf32>
    %9 = arith.addf %8, %7 : vector<2x128xf32>
    %10 = arith.divf %8, %9 : vector<2x128xf32>
    %c0_6 = arith.constant 0 : index
    %c0_7 = arith.constant 0 : index
    %11 = vector.load %arg4[%c0_6, %c0_7] : memref<2x128xf32, #tpu.memory_space<vmem>>, vector<2x128xf32>
    tpu.vector_store %arg4[%c0_6, %c0_7], %10 {strides = array<i32>} : memref<2x128xf32, #tpu.memory_space<vmem>>, vector<2x128xf32>,
    return
  }
  func.func @transform_0(%arg0: i32) -> (i32, i32) {
    %c0_i32 = arith.constant 0 : i32
    %c0_i32_0 = arith.constant 0 : i32
    return %arg0, %c0_i32 : i32, i32
  }
  func.func @transform_1(%arg0: i32) -> (i32, i32) {
    %c0_i32 = arith.constant 0 : i32
    %c0_i32_0 = arith.constant 0 : i32
    %c0_i32_1 = arith.constant 0 : i32
    return %c0_i32, %c0_i32_0 : i32, i32
  }
  func.func @transform_2(%arg0: i32) -> (i32, i32) {
    %c0_i32 = arith.constant 0 : i32
    %c0_i32_0 = arith.constant 0 : i32
    %c0_i32_1 = arith.constant 0 : i32
    return %c0_i32, %c0_i32_0 : i32, i32
  }
  func.func @transform_3(%arg0: i32) -> (i32, i32) {
    %c0_i32 = arith.constant 0 : i32
    %c0_i32_0 = arith.constant 0 : i32
    return %arg0, %c0_i32 : i32, i32
  }
}

</mosaic_0001>

<bundles_post_ra>
// kernel: tpu_custom_call.1
= control target key start
LH: loop header
LB: loop body
LE: loop exit
PB: predicated region body
PF: predicated region fallthrough
CT: control target
= control target key end

     0   :  { %9 = vsyncpa [#allocation4], 0  ;;  %s1494_s0 = inlined_call_operand.hbm [shape: f32[2,4096], index: 0, kind: input, shape index: {}]   ;;  %s1495_s1 = inlined_call_operand.hbm [shape: f32[4096,128], index: 1, kind: input, shape index: {}]   ;;  %s1496_s2 = inlined_call_operand.<no memory space> [shape: f32[1,1], index: 2, kind: input, shape index: {}]   ;;  %s1497_s3 = inlined_call_operand.hbm [shape: f32[2,128], index: 3, kind: output, shape index: {}]  }
   0x1   :  { %10 = vsyncpa [#allocation7], 0 }
   0x2   :  { %11 = vsyncpa [#allocation5], 0  ;;  %s17_s14 = sshll.u32 %s1494_s0, 4  ;;  %s1415_s15 = smov [#allocation3]   ;;  %s18_s14 = int_to_ptr.hbm [resolvable:$true] %s17_s14 }
   0x3   :  { %s19_s16 = sshll.u32 %s1415_s15, 4  ;;  %s27_s19 = sshll.u32 %s1495_s1, 4  ;;  %s20_s16 = int_to_ptr.vmem [resolvable:$true] %s19_s16  ;;  %s28_s19 = int_to_ptr.hbm [resolvable:$true] %s27_s19 }
   0x4   :  { %22 = dma.hbm_to_vmem [thread:$0]  %s18_s14, 1024, %s20_s16, [#allocation4]  }
   0x5   :  { %s1416_s20 = smov [#allocation6]   ;;  %s1417_s22 = smov 128  }
   0x6   :  { %s29_s21 = sshll.u32 %s1416_s20, 4  ;;  %s1418_s23 = smov 8   ;;  %s30_s21 = int_to_ptr.vmem [resolvable:$true] %s29_s21 }
   0x7   :  { %35 = dma.hbm_to_vmem [thread:$0]  %s28_s19, 65536, %s30_s21, [#allocation7], %s1417_s22, %s1417_s22, %s1418_s23  }
   0x8   :  { %1409 = dma.done.wait [#allocation4], 1024  }
   0x9   :  { %1410 = vsyncadd [#allocation4], 4294966272 }
   0xa   :  { %1411 = dma.done.wait [#allocation7], 65536  }
   0xb   :  { %1412 = vsyncadd [#allocation7], 4294901760  ;;  %v69_v0 = vld [vmem:[#allocation6 + $0x78] sm:$0xff]  ;;  %v68_v2 = vld [vmem:[#allocation6 + $0x70] sm:$0xff]  ;;  %s1316_s27 = sshll.u32 %s1497_s3, 4  ;;  %s1317_s27 = int_to_ptr.hbm [resolvable:$true] %s1316_s27 }
   0xc   :  { %v101_v1 = vld [vmem:[#allocation6 + $0x178] sm:$0xff]  ;;  %649 = vmatpush.msra.mxu0 %v69_v0  ;;  %v100_v4 = vld [vmem:[#allocation6 + $0x170] sm:$0xff]  ;;  %v67_v6 = vld [vmem:[#allocation6 + $0x68] sm:$0xff] }
   0xd   :  { %689 = vmatpush.msra.mxu2 %v101_v1  ;;  %v85_v3 = vld [vmem:[#allocation6 + $0xf8] sm:$0xff]  ;;  %v84_v7 = vld [vmem:[#allocation6 + $0xf0] sm:$0xff]  ;;  %v99_v8 = vld [vmem:[#allocation6 + $0x168] sm:$0xff] }
   0xe   :  { %v117_v5 = vld [vmem:[#allocation6 + $0x1f8] sm:$0xff]  ;;  %669 = vmatpush.msra.mxu1 %v85_v3  ;;  %650 = vmatpush.msra.mxu0 %v68_v2  ;;  %v116_v9 = vld [vmem:[#allocation6 + $0x1f0] sm:$0xff]  ;;  %v83_v10 = vld [vmem:[#allocation6 + $0xe8] sm:$0xff] }
   0xf   :  { %709 = vmatpush.msra.mxu3 %v117_v5  ;;  %690 = vmatpush.msra.mxu2 %v100_v4  ;;  %v66_v11 = vld [vmem:[#allocation6 + $0x60] sm:$0xff]  ;;  %v115_v13 = vld [vmem:[#allocation6 + $0x1e8] sm:$0xff]  ;;  %v65_v16 = vld [vmem:[#allocation6 + $0x58] sm:$0xff] }
  0x10   :  { %670 = vmatpush.msra.mxu1 %v84_v7  ;;  %v98_v12 = vld [vmem:[#allocation6 + $0x160] sm:$0xff]  ;;  %651 = vmatpush.msra.mxu0 %v67_v6  ;;  %v97_v17 = vld [vmem:[#allocation6 + $0x158] sm:$0xff]  ;;  %v64_v20 = vld [vmem:[#allocation6 + $0x50] sm:$0xff] }
  0x11   :  { %710 = vmatpush.msra.mxu3 %v116_v9  ;;  %691 = vmatpush.msra.mxu2 %v99_v8  ;;  %v82_v14 = vld [vmem:[#allocation6 + $0xe0] sm:$0xff]  ;;  %v81_v18 = vld [vmem:[#allocation6 + $0xd8] sm:$0xff]  ;;  %v96_v21 = vld [vmem:[#allocation6 + $0x150] sm:$0xff] }
  0x12   :  { %v114_v15 = vld [vmem:[#allocation6 + $0x1e0] sm:$0xff]  ;;  %671 = vmatpush.msra.mxu1 %v83_v10  ;;  %652 = vmatpush.msra.mxu0 %v66_v11  ;;  %v113_v19 = vld [vmem:[#allocation6 + $0x1d8] sm:$0xff]  ;;  %v80_v22 = vld [vmem:[#allocation6 + $0xd0] sm:$0xff] }
  0x13   :  { %711 = vmatpush.msra.mxu3 %v115_v13  ;;  %692 = vmatpush.msra.mxu2 %v98_v12  ;;  %v112_v23 = vld [vmem:[#allocation6 + $0x1d0] sm:$0xff]  ;;  %v63_v24 = vld [vmem:[#allocation6 + $0x48] sm:$0xff]  ;;  %v62_v28 = vld [vmem:[#allocation6 + $0x40] sm:$0xff] }
  0x14   :  { %672 = vmatpush.msra.mxu1 %v82_v14  ;;  %653 = vmatpush.msra.mxu0 %v65_v16  ;;  %v95_v25 = vld [vmem:[#allocation6 + $0x148] sm:$0xff]  ;;  %v94_v29 = vld [vmem:[#allocation6 + $0x140] sm:$0xff]  ;;  %v61_v32 = vld [vmem:[#allocation6 + $0x38] sm:$0xff] }
  0x15   :  { %712 = vmatpush.msra.mxu3 %v114_v15  ;;  %693 = vmatpush.msra.mxu2 %v97_v17  ;;  %v79_v26 = vld [vmem:[#allocation6 + $0xc8] sm:$0xff]  ;;  %v78_v30 = vld [vmem:[#allocation6 + $0xc0] sm:$0xff]  ;;  %v93_v33 = vld [vmem:[#allocation6 + $0x138] sm:$0xff] }
  0x16   :  { %673 = vmatpush.msra.mxu1 %v81_v18  ;;  %654 = vmatpush.msra.mxu0 %v64_v20  ;;  %v111_v27 = vld [vmem:[#allocation6 + $0x1c8] sm:$0xff]  ;;  %v110_v31 = vld [vmem:[#allocation6 + $0x1c0] sm:$0xff]  ;;  %v77_v34 = vld [vmem:[#allocation6 + $0xb8] sm:$0xff] }
  0x17   :  { %713 = vmatpush.msra.mxu3 %v113_v19  ;;  %694 = vmatpush.msra.mxu2 %v96_v21  ;;  %v109_v35 = vld [vmem:[#allocation6 + $0x1b8] sm:$0xff]  ;;  %v60_v36 = vld [vmem:[#allocation6 + $0x30] sm:$0xff]  ;;  %v59_v40 = vld [vmem:[#allocation6 + $0x28] sm:$0xff] }
  0x18   :  { %674 = vmatpush.msra.mxu1 %v80_v22  ;;  %655 = vmatpush.msra.mxu0 %v63_v24  ;;  %v92_v37 = vld [vmem:[#allocation6 + $0x130] sm:$0xff]  ;;  %v91_v41 = vld [vmem:[#allocation6 + $0x128] sm:$0xff]  ;;  %v58_v44 = vld [vmem:[#allocation6 + $0x20] sm:$0xff] }
  0x19   :  { %714 = vmatpush.msra.mxu3 %v112_v23  ;;  %695 = vmatpush.msra.mxu2 %v95_v25  ;;  %v76_v38 = vld [vmem:[#allocation6 + $0xb0] sm:$0xff]  ;;  %v75_v42 = vld [vmem:[#allocation6 + $0xa8] sm:$0xff]  ;;  %v90_v45 = vld [vmem:[#allocation6 + $0x120] sm:$0xff] }
  0x1a   :  { %675 = vmatpush.msra.mxu1 %v79_v26  ;;  %656 = vmatpush.msra.mxu0 %v62_v28  ;;  %v108_v39 = vld [vmem:[#allocation6 + $0x1b0] sm:$0xff]  ;;  %v107_v43 = vld [vmem:[#allocation6 + $0x1a8] sm:$0xff]  ;;  %v74_v46 = vld [vmem:[#allocation6 + $0xa0] sm:$0xff] }
  0x1b   :  { %715 = vmatpush.msra.mxu3 %v111_v27  ;;  %696 = vmatpush.msra.mxu2 %v94_v29  ;;  %v106_v47 = vld [vmem:[#allocation6 + $0x1a0] sm:$0xff]  ;;  %v57_v48 = vld [vmem:[#allocation6 + $0x18] sm:$0xff]  ;;  %v56_v52 = vld [vmem:[#allocation6 + $0x10] sm:$0xff] }
  0x1c   :  { %676 = vmatpush.msra.mxu1 %v78_v30  ;;  %657 = vmatpush.msra.mxu0 %v61_v32  ;;  %v89_v49 = vld [vmem:[#allocation6 + $0x118] sm:$0xff]  ;;  %v88_v53 = vld [vmem:[#allocation6 + $0x110] sm:$0xff]  ;;  %v55_v56 = vld [vmem:[#allocation6 + $0x8] sm:$0xff] }
  0x1d   :  { %716 = vmatpush.msra.mxu3 %v110_v31  ;;  %697 = vmatpush.msra.mxu2 %v93_v33  ;;  %v73_v50 = vld [vmem:[#allocation6 + $0x98] sm:$0xff]  ;;  %v72_v54 = vld [vmem:[#allocation6 + $0x90] sm:$0xff]  ;;  %v87_v57 = vld [vmem:[#allocation6 + $0x108] sm:$0xff] }
  0x1e   :  { %677 = vmatpush.msra.mxu1 %v77_v34  ;;  %658 = vmatpush.msra.mxu0 %v60_v36  ;;  %v105_v51 = vld [vmem:[#allocation6 + $0x198] sm:$0xff]  ;;  %v104_v55 = vld [vmem:[#allocation6 + $0x190] sm:$0xff]  ;;  %v71_v58 = vld [vmem:[#allocation6 + $0x88] sm:$0xff] }
  0x1f   :  { %717 = vmatpush.msra.mxu3 %v109_v35  ;;  %698 = vmatpush.msra.mxu2 %v92_v37  ;;  %v103_v59 = vld [vmem:[#allocation6 + $0x188] sm:$0xff]  ;;  %v54_v60 = vld [vmem:[#allocation6] sm:$0xff]  ;;  %v133_v62 = vld [vmem:[#allocation6 + $0x278] sm:$0xff] }
  0x20   :  { %678 = vmatpush.msra.mxu1 %v76_v38  ;;  %659 = vmatpush.msra.mxu0 %v59_v40  ;;  %v86_v61 = vld [vmem:[#allocation6 + $0x100] sm:$0xff]  ;;  %v165_v63 = vld [vmem:[#allocation6 + $0x378] sm:$0xff]  ;;  %v132_v2 = vld [vmem:[#allocation6 + $0x270] sm:$0xff] }
  0x21   :  { %718 = vmatpush.msra.mxu3 %v108_v39  ;;  %699 = vmatpush.msra.mxu2 %v91_v41  ;;  %v70_v0 = vld [vmem:[#allocation6 + $0x80] sm:$0xff]  ;;  %v149_v3 = vld [vmem:[#allocation6 + $0x2f8] sm:$0xff]  ;;  %v164_v4 = vld [vmem:[#allocation6 + $0x370] sm:$0xff] }
  0x22   :  { %679 = vmatpush.msra.mxu1 %v75_v42  ;;  %660 = vmatpush.msra.mxu0 %v58_v44  ;;  %v102_v1 = vld [vmem:[#allocation6 + $0x180] sm:$0xff]  ;;  %v181_v5 = vld [vmem:[#allocation6 + $0x3f8] sm:$0xff]  ;;  %v131_v6 = vld [vmem:[#allocation6 + $0x268] sm:$0xff] }
  0x23   :  { %719 = vmatpush.msra.mxu3 %v107_v43  ;;  %700 = vmatpush.msra.mxu2 %v90_v45  ;;  %v148_v7 = vld [vmem:[#allocation6 + $0x2f0] sm:$0xff]  ;;  %v163_v8 = vld [vmem:[#allocation6 + $0x368] sm:$0xff]  ;;  %v130_v10 = vld [vmem:[#allocation6 + $0x260] sm:$0xff] }
  0x24   :  { %680 = vmatpush.msra.mxu1 %v74_v46  ;;  %661 = vmatpush.msra.mxu0 %v57_v48  ;;  %v180_v9 = vld [vmem:[#allocation6 + $0x3f0] sm:$0xff]  ;;  %v147_v11 = vld [vmem:[#allocation6 + $0x2e8] sm:$0xff]  ;;  %v162_v12 = vld [vmem:[#allocation6 + $0x360] sm:$0xff] }
  0x25   :  { %720 = vmatpush.msra.mxu3 %v106_v47  ;;  %701 = vmatpush.msra.mxu2 %v89_v49  ;;  %v179_v13 = vld [vmem:[#allocation6 + $0x3e8] sm:$0xff]  ;;  %v129_v14 = vld [vmem:[#allocation6 + $0x258] sm:$0xff]  ;;  %v146_v15 = vld [vmem:[#allocation6 + $0x2e0] sm:$0xff] }
  0x26   :  { %681 = vmatpush.msra.mxu1 %v73_v50  ;;  %662 = vmatpush.msra.mxu0 %v56_v52  ;;  %v161_v16 = vld [vmem:[#allocation6 + $0x358] sm:$0xff]  ;;  %v178_v17 = vld [vmem:[#allocation6 + $0x3e0] sm:$0xff]  ;;  %v128_v18 = vld [vmem:[#allocation6 + $0x250] sm:$0xff] }
  0x27   :  { %721 = vmatpush.msra.mxu3 %v105_v51  ;;  %702 = vmatpush.msra.mxu2 %v88_v53  ;;  %v145_v19 = vld [vmem:[#allocation6 + $0x2d8] sm:$0xff]  ;;  %v160_v20 = vld [vmem:[#allocation6 + $0x350] sm:$0xff]  ;;  %v127_v22 = vld [vmem:[#allocation6 + $0x248] sm:$0xff] }
  0x28   :  { %682 = vmatpush.msra.mxu1 %v72_v54  ;;  %663 = vmatpush.msra.mxu0 %v55_v56  ;;  %v177_v21 = vld [vmem:[#allocation6 + $0x3d8] sm:$0xff]  ;;  %v144_v23 = vld [vmem:[#allocation6 + $0x2d0] sm:$0xff]  ;;  %v159_v24 = vld [vmem:[#allocation6 + $0x348] sm:$0xff] }
  0x29   :  { %722 = vmatpush.msra.mxu3 %v104_v55  ;;  %703 = vmatpush.msra.mxu2 %v87_v57  ;;  %v176_v25 = vld [vmem:[#allocation6 + $0x3d0] sm:$0xff]  ;;  %v46_v26 = vld [vmem:[#allocation3] sm:$0xff]  ;;  %v143_v28 = vld [vmem:[#allocation6 + $0x2c8] sm:$0xff] }
  0x2a   :  { %683 = vmatpush.msra.mxu1 %v71_v58  ;;  %664 = vmatpush.msra.mxu0 %v54_v60  ;;  %v126_v27 = vld [vmem:[#allocation6 + $0x240] sm:$0xff]  ;;  %576 = vst [vmem:[#allocation1] ss:$4 sm:$0xff] %v46_v26  ;;  %v175_v30 = vld [vmem:[#allocation6 + $0x3c8] sm:$0xff]  ;;  %v125_v31 = vld [vmem:[#allocation6 + $0x238] sm:$0xff] }
  0x2b   :  { %723 = vmatpush.msra.mxu3 %v103_v59  ;;  %704 = vmatpush.msra.mxu2 %v86_v61  ;;  %v158_v29 = vld [vmem:[#allocation6 + $0x340] sm:$0xff]  ;;  %v157_v33 = vld [vmem:[#allocation6 + $0x338] sm:$0xff]  ;;  %v124_v35 = vld [vmem:[#allocation6 + $0x230] sm:$0xff] }
  0x2c   :  { %729 = vmatpush.msrb.mxu0 %v133_v62  ;;  %684 = vmatpush.msra.mxu1 %v70_v0  ;;  %v142_v32 = vld [vmem:[#allocation6 + $0x2c0] sm:$0xff]  ;;  %v141_v36 = vld [vmem:[#allocation6 + $0x2b8] sm:$0xff]  ;;  %v156_v37 = vld [vmem:[#allocation6 + $0x330] sm:$0xff] }
  0x2d   :  { %769 = vmatpush.msrb.mxu2 %v165_v63  ;;  %724 = vmatpush.msra.mxu3 %v102_v1  ;;  %v174_v34 = vld [vmem:[#allocation6 + $0x3c0] sm:$0xff]  ;;  %v173_v38 = vld [vmem:[#allocation6 + $0x3b8] sm:$0xff]  ;;  %v123_v39 = vld [vmem:[#allocation6 + $0x228] sm:$0xff] }
  0x2e   :  { %730 = vmatpush.msrb.mxu0 %v132_v2  ;;  %749 = vmatpush.msrb.mxu1 %v149_v3  ;;  %v140_v40 = vld [vmem:[#allocation6 + $0x2b0] sm:$0xff]  ;;  %v155_v41 = vld [vmem:[#allocation6 + $0x328] sm:$0xff]  ;;  %v122_v44 = vld [vmem:[#allocation6 + $0x220] sm:$0xff] }
  0x2f   :  { %770 = vmatpush.msrb.mxu2 %v164_v4  ;;  %789 = vmatpush.msrb.mxu3 %v181_v5  ;;  %v172_v42 = vld [vmem:[#allocation6 + $0x3b0] sm:$0xff]  ;;  %v47_v43 = vld [vmem:[#allocation3 + $0x8] sm:$0xff]  ;;  %v154_v47 = vld [vmem:[#allocation6 + $0x320] sm:$0xff] }
  0x30   :  { %731 = vmatpush.msrb.mxu0 %v131_v6  ;;  %750 = vmatpush.msrb.mxu1 %v148_v7  ;;  %v139_v45 = vld [vmem:[#allocation6 + $0x2a8] sm:$0xff]  ;;  %v48_v46 = vld [vmem:[#allocation3 + $0x10] sm:$0xff]  ;;  %578 = vst [vmem:[#allocation1 + $0x20] ss:$4 sm:$0xff] %v47_v43  ;;  %v121_v53 = vld [vmem:[#allocation6 + $0x218] sm:$0xff] }
  0x31   :  { %771 = vmatpush.msrb.mxu2 %v163_v8  ;;  %790 = vmatpush.msrb.mxu3 %v180_v9  ;;  %v579_v48 = vld.sshfl [vmem:[#allocation1] sm:$0xff pattern:$0x73625140]  ;;  %v581_v49 = vld.sshfl [vmem:[#allocation1 + $0x10] sm:$0xff pattern:$0x73625140] }
  0x32   :  { %732 = vmatpush.msrb.mxu0 %v130_v10  ;;  %751 = vmatpush.msrb.mxu1 %v147_v11  ;;  %v1446_v50 = vld.sshfl [vmem:[#allocation1 + $0x8] sm:$0xff pattern:$0x73625140]  ;;  %v1448_v51 = vld.sshfl [vmem:[#allocation1 + $0x18] sm:$0xff pattern:$0x73625140] }
  0x33   :  { %772 = vmatpush.msrb.mxu2 %v162_v12  ;;  %791 = vmatpush.msrb.mxu3 %v179_v13  ;;  %v171_v52 = vld [vmem:[#allocation6 + $0x3a8] sm:$0xff]  ;;  %v138_v54 = vld [vmem:[#allocation6 + $0x2a0] sm:$0xff]  ;;  %587 = vst [vmem:[#allocation1] ss:$4 sm:$0xff] %v48_v46  ;;  %v153_v55 = vld [vmem:[#allocation6 + $0x318] sm:$0xff] }
  0x34   :  { %733 = vmatpush.msrb.mxu0 %v129_v14  ;;  %752 = vmatpush.msrb.mxu1 %v146_v15  ;;  %v170_v56 = vld [vmem:[#allocation6 + $0x3a0] sm:$0xff]  ;;  %v120_v57 = vld [vmem:[#allocation6 + $0x210] sm:$0xff]  ;;  %v137_v58 = vld [vmem:[#allocation6 + $0x298] sm:$0xff] }
  0x35   :  { %773 = vmatpush.msrb.mxu2 %v161_v16  ;;  %792 = vmatpush.msrb.mxu3 %v178_v17  ;;  %v152_v59 = vld [vmem:[#allocation6 + $0x310] sm:$0xff]  ;;  %v169_v60 = vld [vmem:[#allocation6 + $0x398] sm:$0xff]  ;;  %v119_v61 = vld [vmem:[#allocation6 + $0x208] sm:$0xff] }
  0x36   :  { %734 = vmatpush.msrb.mxu0 %v128_v18  ;;  %753 = vmatpush.msrb.mxu1 %v145_v19  ;;  %v136_v62 = vld [vmem:[#allocation6 + $0x290] sm:$0xff]  ;;  %v49_v63 = vld [vmem:[#allocation3 + $0x18] sm:$0xff]  ;;  %v151_v4 = vld [vmem:[#allocation6 + $0x308] sm:$0xff] }
  0x37   :  { %774 = vmatpush.msrb.mxu2 %v160_v20  ;;  %793 = vmatpush.msrb.mxu3 %v177_v21  ;;  %v1450_v0 = vld.sshfl [vmem:[#allocation1 + $0x30] sm:$0xff pattern:$0x73625140]  ;;  %v1452_v1 = vld.sshfl [vmem:[#allocation1 + $0x20] sm:$0xff pattern:$0x73625140] }
  0x38   :  { %735 = vmatpush.msrb.mxu0 %v127_v22  ;;  %754 = vmatpush.msrb.mxu1 %v144_v23  ;;  %v1454_v2 = vld.sshfl [vmem:[#allocation1 + $0x38] sm:$0xff pattern:$0x73625140]  ;;  %v1456_v3 = vld.sshfl [vmem:[#allocation1 + $0x28] sm:$0xff pattern:$0x73625140] }
  0x39   :  { %775 = vmatpush.msrb.mxu2 %v159_v24  ;;  %794 = vmatpush.msrb.mxu3 %v176_v25  ;;  %v168_v5 = vld [vmem:[#allocation6 + $0x390] sm:$0xff]  ;;  %588 = vst [vmem:[#allocation1 + $0x20] ss:$4 sm:$0xff] %v49_v63  ;;  %v118_v6 = vld [vmem:[#allocation6 + $0x200] sm:$0xff]  ;;  %v135_v7 = vld [vmem:[#allocation6 + $0x288] sm:$0xff] }
  0x3a   :  { %736 = vmatpush.msrb.mxu0 %v126_v27  ;;  %755 = vmatpush.msrb.mxu1 %v143_v28  ;;  %v150_v8 = vld [vmem:[#allocation6 + $0x300] sm:$0xff]  ;;  %v167_v9 = vld [vmem:[#allocation6 + $0x388] sm:$0xff]  ;;  %v197_v10 = vld [vmem:[#allocation6 + $0x478] sm:$0xff] }
  0x3b   :  { %776 = vmatpush.msrb.mxu2 %v158_v29  ;;  %795 = vmatpush.msrb.mxu3 %v175_v30  ;;  %v229_v11 = vld [vmem:[#allocation6 + $0x578] sm:$0xff]  ;;  %v134_v12 = vld [vmem:[#allocation6 + $0x280] sm:$0xff]  ;;  %v196_v14 = vld [vmem:[#allocation6 + $0x470] sm:$0xff] }
  0x3c   :  { %737 = vmatpush.msrb.mxu0 %v125_v31  ;;  %756 = vmatpush.msrb.mxu1 %v142_v32  ;;  %v166_v13 = vld [vmem:[#allocation6 + $0x380] sm:$0xff]  ;;  %v213_v15 = vld [vmem:[#allocation6 + $0x4f8] sm:$0xff]  ;;  %v228_v16 = vld [vmem:[#allocation6 + $0x570] sm:$0xff] }
  0x3d   :  { %777 = vmatpush.msrb.mxu2 %v157_v33  ;;  %796 = vmatpush.msrb.mxu3 %v174_v34  ;;  %v245_v17 = vld [vmem:[#allocation6 + $0x5f8] sm:$0xff]  ;;  %v195_v18 = vld [vmem:[#allocation6 + $0x468] sm:$0xff]  ;;  %v212_v19 = vld [vmem:[#allocation6 + $0x4f0] sm:$0xff] }
  0x3e   :  { %738 = vmatpush.msrb.mxu0 %v124_v35  ;;  %757 = vmatpush.msrb.mxu1 %v141_v36  ;;  %v227_v20 = vld [vmem:[#allocation6 + $0x568] sm:$0xff]  ;;  %v244_v21 = vld [vmem:[#allocation6 + $0x5f0] sm:$0xff]  ;;  %v194_v22 = vld [vmem:[#allocation6 + $0x460] sm:$0xff] }
  0x3f   :  { %778 = vmatpush.msrb.mxu2 %v156_v37  ;;  %797 = vmatpush.msrb.mxu3 %v173_v38  ;;  %v211_v23 = vld [vmem:[#allocation6 + $0x4e8] sm:$0xff]  ;;  %v226_v24 = vld [vmem:[#allocation6 + $0x560] sm:$0xff]  ;;  %v1460_v26 = vld.sshfl [vmem:[#allocation1] sm:$0xff pattern:$0x73625140] }
  0x40   :  { %739 = vmatpush.msrb.mxu0 %v123_v39  ;;  %758 = vmatpush.msrb.mxu1 %v140_v40  ;;  %v243_v25 = vld [vmem:[#allocation6 + $0x5e8] sm:$0xff]  ;;  %v1464_v28 = vld.sshfl [vmem:[#allocation1 + $0x8] sm:$0xff pattern:$0x73625140]  ;;  %v193_v29 = vld [vmem:[#allocation6 + $0x458] sm:$0xff] }
  0x41   :  { %779 = vmatpush.msrb.mxu2 %v155_v41  ;;  %798 = vmatpush.msrb.mxu3 %v172_v42  ;;  %v1462_v27 = vld.sshfl [vmem:[#allocation1 + $0x10] sm:$0xff pattern:$0x73625140]  ;;  %v50_v30 = vld [vmem:[#allocation3 + $0x20] sm:$0xff]  ;;  %v225_v33 = vld [vmem:[#allocation6 + $0x558] sm:$0xff] }
  0x42   :  { %740 = vmatpush.msrb.mxu0 %v122_v44  ;;  %759 = vmatpush.msrb.mxu1 %v139_v45  ;;  %v1466_v31 = vld.sshfl [vmem:[#allocation1 + $0x18] sm:$0xff pattern:$0x73625140]  ;;  %v210_v32 = vld [vmem:[#allocation6 + $0x4e0] sm:$0xff]  ;;  %v209_v36 = vld [vmem:[#allocation6 + $0x4d8] sm:$0xff] }
  0x43   :  { %780 = vmatpush.msrb.mxu2 %v154_v47  ;;  %799 = vmatpush.msrb.mxu3 %v171_v52  ;;  %597 = vst [vmem:[#allocation1] ss:$4 sm:$0xff] %v50_v30  ;;  %v242_v34 = vld [vmem:[#allocation6 + $0x5e0] sm:$0xff]  ;;  %v192_v35 = vld [vmem:[#allocation6 + $0x450] sm:$0xff]  ;;  %v241_v38 = vld [vmem:[#allocation6 + $0x5d8] sm:$0xff] }
  0x44   :  { %741 = vmatpush.msrb.mxu0 %v121_v53  ;;  %760 = vmatpush.msrb.mxu1 %v138_v54  ;;  %v224_v37 = vld [vmem:[#allocation6 + $0x550] sm:$0xff]  ;;  %v191_v39 = vld [vmem:[#allocation6 + $0x448] sm:$0xff]  ;;  %v190_v43 = vld [vmem:[#allocation6 + $0x440] sm:$0xff] }
  0x45   :  { %781 = vmatpush.msrb.mxu2 %v153_v55  ;;  %800 = vmatpush.msrb.mxu3 %v170_v56  ;;  %v208_v40 = vld [vmem:[#allocation6 + $0x4d0] sm:$0xff]  ;;  %v223_v41 = vld [vmem:[#allocation6 + $0x548] sm:$0xff]  ;;  %v222_v45 = vld [vmem:[#allocation6 + $0x540] sm:$0xff] }
  0x46   :  { %742 = vmatpush.msrb.mxu0 %v120_v57  ;;  %761 = vmatpush.msrb.mxu1 %v137_v58  ;;  %v240_v42 = vld [vmem:[#allocation6 + $0x5d0] sm:$0xff]  ;;  %v207_v44 = vld [vmem:[#allocation6 + $0x4c8] sm:$0xff]  ;;  %v189_v47 = vld [vmem:[#allocation6 + $0x438] sm:$0xff] }
  0x47   :  { %782 = vmatpush.msrb.mxu2 %v152_v59  ;;  %801 = vmatpush.msrb.mxu3 %v169_v60  ;;  %v239_v46 = vld [vmem:[#allocation6 + $0x5c8] sm:$0xff]  ;;  %v205_v52 = vld [vmem:[#allocation6 + $0x4b8] sm:$0xff]  ;;  %v220_v53 = vld [vmem:[#allocation6 + $0x530] sm:$0xff] }
  0x48   :  { %743 = vmatpush.msrb.mxu0 %v119_v61  ;;  %762 = vmatpush.msrb.mxu1 %v136_v62  ;;  %v237_v54 = vld [vmem:[#allocation6 + $0x5b8] sm:$0xff]  ;;  %v187_v55 = vld [vmem:[#allocation6 + $0x428] sm:$0xff]  ;;  %v204_v56 = vld [vmem:[#allocation6 + $0x4b0] sm:$0xff] }
  0x49   :  { %783 = vmatpush.msrb.mxu2 %v151_v4  ;;  %802 = vmatpush.msrb.mxu3 %v168_v5  ;;  %v219_v57 = vld [vmem:[#allocation6 + $0x528] sm:$0xff]  ;;  %v236_v58 = vld [vmem:[#allocation6 + $0x5b0] sm:$0xff]  ;;  %v186_v59 = vld [vmem:[#allocation6 + $0x420] sm:$0xff] }
  0x4a   :  { %744 = vmatpush.msrb.mxu0 %v118_v6  ;;  %763 = vmatpush.msrb.mxu1 %v135_v7  ;;  %v203_v60 = vld [vmem:[#allocation6 + $0x4a8] sm:$0xff]  ;;  %v218_v61 = vld [vmem:[#allocation6 + $0x520] sm:$0xff]  ;;  %v185_v63 = vld [vmem:[#allocation6 + $0x418] sm:$0xff] }
  0x4b   :  { %784 = vmatpush.msrb.mxu2 %v150_v8  ;;  %803 = vmatpush.msrb.mxu3 %v167_v9  ;;  %v235_v62 = vld [vmem:[#allocation6 + $0x5a8] sm:$0xff]  ;;  %v201_v4 = vld [vmem:[#allocation6 + $0x498] sm:$0xff]  ;;  %v216_v5 = vld [vmem:[#allocation6 + $0x510] sm:$0xff] }
  0x4c   :  { %665 = vmatmul.f32.vlgmr.msra.gmra.mxu0 %v579_v48  ;;  %705 = vmatmul.f32.vlgmr.msra.gmra.mxu2 %v581_v49  ;;  %v206_v48 = vld [vmem:[#allocation6 + $0x4c0] sm:$0xff]  ;;  %v221_v49 = vld [vmem:[#allocation6 + $0x538] sm:$0xff]  ;;  %v183_v7 = vld [vmem:[#allocation6 + $0x408] sm:$0xff] }
  0x4d   :  { %809 = vmatpush.msra.mxu0 %v197_v10  ;;  %849 = vmatpush.msra.mxu2 %v229_v11  ;;  %v233_v6 = vld [vmem:[#allocation6 + $0x598] sm:$0xff]  ;;  %v200_v8 = vld [vmem:[#allocation6 + $0x490] sm:$0xff]  ;;  %v215_v9 = vld [vmem:[#allocation6 + $0x508] sm:$0xff] }
  0x4e   :  { %764 = vmatpush.msrb.mxu1 %v134_v12  ;;  %804 = vmatpush.msrb.mxu3 %v166_v13  ;;  %v232_v10 = vld [vmem:[#allocation6 + $0x590] sm:$0xff]  ;;  %v182_v11 = vld [vmem:[#allocation6 + $0x400] sm:$0xff]  ;;  %v199_v12 = vld [vmem:[#allocation6 + $0x488] sm:$0xff] }
  0x4f   :  { %685 = vmatmul.f32.vlgmr.msra.gmra.mxu1 %v1446_v50  ;;  %725 = vmatmul.f32.vlgmr.msra.gmra.mxu3 %v1448_v51  ;;  %v238_v50 = vld [vmem:[#allocation6 + $0x5c0] sm:$0xff]  ;;  %v188_v51 = vld [vmem:[#allocation6 + $0x430] sm:$0xff] }
  0x50   :  { %810 = vmatpush.msra.mxu0 %v196_v14  ;;  %829 = vmatpush.msra.mxu1 %v213_v15  ;;  %v214_v13 = vld [vmem:[#allocation6 + $0x500] sm:$0xff]  ;;  %v231_v14 = vld [vmem:[#allocation6 + $0x588] sm:$0xff]  ;;  %v261_v15 = vld [vmem:[#allocation6 + $0x678] sm:$0xff] }
  0x51   :  { %850 = vmatpush.msra.mxu2 %v228_v16  ;;  %869 = vmatpush.msra.mxu3 %v245_v17  ;;  %v293_v16 = vld [vmem:[#allocation6 + $0x778] sm:$0xff]  ;;  %v198_v17 = vld [vmem:[#allocation6 + $0x480] sm:$0xff] }
  0x52   :  { %811 = vmatpush.msra.mxu0 %v195_v18  ;;  %830 = vmatpush.msra.mxu1 %v212_v19  ;;  %v230_v18 = vld [vmem:[#allocation6 + $0x580] sm:$0xff]  ;;  %v260_v19 = vld [vmem:[#allocation6 + $0x670] sm:$0xff] }
  0x53   :  { %851 = vmatpush.msra.mxu2 %v227_v20  ;;  %870 = vmatpush.msra.mxu3 %v244_v21  ;;  %v277_v20 = vld [vmem:[#allocation6 + $0x6f8] sm:$0xff]  ;;  %v292_v21 = vld [vmem:[#allocation6 + $0x770] sm:$0xff]  ;;  %v258_v30 = vld [vmem:[#allocation6 + $0x660] sm:$0xff] }
  0x54   :  { %812 = vmatpush.msra.mxu0 %v194_v22  ;;  %831 = vmatpush.msra.mxu1 %v211_v23  ;;  %v309_v22 = vld [vmem:[#allocation6 + $0x7f8] sm:$0xff]  ;;  %v259_v23 = vld [vmem:[#allocation6 + $0x668] sm:$0xff] }
  0x55   :  { %852 = vmatpush.msra.mxu2 %v226_v24  ;;  %871 = vmatpush.msra.mxu3 %v243_v25  ;;  %v276_v24 = vld [vmem:[#allocation6 + $0x6f0] sm:$0xff]  ;;  %v291_v25 = vld [vmem:[#allocation6 + $0x768] sm:$0xff] }
  0x56   :  { %785 = vmatmul.f32.vlgmr.msrb.gmra.mxu2 %v1450_v0  ;;  %813 = vmatpush.msra.mxu0 %v193_v29  ;;  %v202_v0 = vld [vmem:[#allocation6 + $0x4a0] sm:$0xff]  ;;  %v308_v29 = vld [vmem:[#allocation6 + $0x7f0] sm:$0xff] }
  0x57   :  { %832 = vmatpush.msra.mxu1 %v210_v32  ;;  %853 = vmatpush.msra.mxu2 %v225_v33  ;;  %v1480_v32 = vld.sshfl [vmem:[#allocation1 + $0x28] sm:$0xff pattern:$0x73625140]  ;;  %v275_v33 = vld [vmem:[#allocation6 + $0x6e8] sm:$0xff] }
  0x58   :  { %872 = vmatpush.msra.mxu3 %v242_v34  ;;  %745 = vmatmul.f32.vlgmr.msrb.gmra.mxu0 %v1452_v1  ;;  %v217_v1 = vld [vmem:[#allocation6 + $0x518] sm:$0xff]  ;;  %v51_v34 = vld [vmem:[#allocation3 + $0x28] sm:$0xff] }
  0x59   :  { %805 = vmatmul.f32.vlgmr.msrb.gmra.mxu3 %v1454_v2  ;;  %814 = vmatpush.msra.mxu0 %v192_v35  ;;  %v234_v2 = vld [vmem:[#allocation6 + $0x5a0] sm:$0xff]  ;;  %v1482_v35 = vld.sshfl [vmem:[#allocation1 + $0x38] sm:$0xff pattern:$0x73625140] }
  0x5a   :  { %833 = vmatpush.msra.mxu1 %v209_v36  ;;  %854 = vmatpush.msra.mxu2 %v224_v37  ;;  %v257_v36 = vld [vmem:[#allocation6 + $0x658] sm:$0xff]  ;;  %v274_v37 = vld [vmem:[#allocation6 + $0x6e0] sm:$0xff] }
  0x5b   :  { %873 = vmatpush.msra.mxu3 %v241_v38  ;;  %765 = vmatmul.f32.vlgmr.msrb.gmra.mxu1 %v1456_v3  ;;  %v184_v3 = vld [vmem:[#allocation6 + $0x410] sm:$0xff]  ;;  %v289_v38 = vld [vmem:[#allocation6 + $0x758] sm:$0xff] }
  0x5c   :  { %815 = vmatpush.msra.mxu0 %v191_v39  ;;  %834 = vmatpush.msra.mxu1 %v208_v40  ;;  %v306_v39 = vld [vmem:[#allocation6 + $0x7e0] sm:$0xff]  ;;  %v256_v40 = vld [vmem:[#allocation6 + $0x650] sm:$0xff] }
  0x5d   :  { %855 = vmatpush.msra.mxu2 %v223_v41  ;;  %874 = vmatpush.msra.mxu3 %v240_v42  ;;  %v273_v41 = vld [vmem:[#allocation6 + $0x6d8] sm:$0xff]  ;;  %v288_v42 = vld [vmem:[#allocation6 + $0x750] sm:$0xff] }
  0x5e   :  { %816 = vmatpush.msra.mxu0 %v190_v43  ;;  %835 = vmatpush.msra.mxu1 %v207_v44  ;;  %v305_v43 = vld [vmem:[#allocation6 + $0x7d8] sm:$0xff]  ;;  %v255_v44 = vld [vmem:[#allocation6 + $0x648] sm:$0xff] }
  0x5f   :  { %856 = vmatpush.msra.mxu2 %v222_v45  ;;  %875 = vmatpush.msra.mxu3 %v239_v46  ;;  %v272_v45 = vld [vmem:[#allocation6 + $0x6d0] sm:$0xff]  ;;  %v287_v46 = vld [vmem:[#allocation6 + $0x748] sm:$0xff] }
  0x60   :  { %817 = vmatpush.msra.mxu0 %v189_v47  ;;  %836 = vmatpush.msra.mxu1 %v206_v48  ;;  %v304_v47 = vld [vmem:[#allocation6 + $0x7d0] sm:$0xff]  ;;  %v254_v48 = vld [vmem:[#allocation6 + $0x640] sm:$0xff] }
  0x61   :  { %857 = vmatpush.msra.mxu2 %v221_v49  ;;  %876 = vmatpush.msra.mxu3 %v238_v50  ;;  %v271_v49 = vld [vmem:[#allocation6 + $0x6c8] sm:$0xff]  ;;  %v286_v50 = vld [vmem:[#allocation6 + $0x740] sm:$0xff] }
  0x62   :  { %818 = vmatpush.msra.mxu0 %v188_v51  ;;  %837 = vmatpush.msra.mxu1 %v205_v52  ;;  %v303_v51 = vld [vmem:[#allocation6 + $0x7c8] sm:$0xff]  ;;  %v253_v52 = vld [vmem:[#allocation6 + $0x638] sm:$0xff] }
  0x63   :  { %858 = vmatpush.msra.mxu2 %v220_v53  ;;  %877 = vmatpush.msra.mxu3 %v237_v54  ;;  %v270_v53 = vld [vmem:[#allocation6 + $0x6c0] sm:$0xff]  ;;  %v285_v54 = vld [vmem:[#allocation6 + $0x738] sm:$0xff] }
  0x64   :  { %819 = vmatpush.msra.mxu0 %v187_v55  ;;  %838 = vmatpush.msra.mxu1 %v204_v56  ;;  %v302_v55 = vld [vmem:[#allocation6 + $0x7c0] sm:$0xff]  ;;  %v252_v56 = vld [vmem:[#allocation6 + $0x630] sm:$0xff] }
  0x65   :  { %859 = vmatpush.msra.mxu2 %v219_v57  ;;  %878 = vmatpush.msra.mxu3 %v236_v58  ;;  %v269_v57 = vld [vmem:[#allocation6 + $0x6b8] sm:$0xff]  ;;  %v284_v58 = vld [vmem:[#allocation6 + $0x730] sm:$0xff] }
  0x66   :  { %820 = vmatpush.msra.mxu0 %v186_v59  ;;  %839 = vmatpush.msra.mxu1 %v203_v60  ;;  %v301_v59 = vld [vmem:[#allocation6 + $0x7b8] sm:$0xff]  ;;  %v251_v60 = vld [vmem:[#allocation6 + $0x628] sm:$0xff] }
  0x67   :  { %860 = vmatpush.msra.mxu2 %v218_v61  ;;  %879 = vmatpush.msra.mxu3 %v235_v62  ;;  %v268_v61 = vld [vmem:[#allocation6 + $0x6b0] sm:$0xff]  ;;  %v283_v62 = vld [vmem:[#allocation6 + $0x728] sm:$0xff] }
  0x68   :  { %821 = vmatpush.msra.mxu0 %v185_v63  ;;  %840 = vmatpush.msra.mxu1 %v202_v0  ;;  %v300_v63 = vld [vmem:[#allocation6 + $0x7b0] sm:$0xff]  ;;  %v250_v0 = vld [vmem:[#allocation6 + $0x620] sm:$0xff] }
  0x69   :  { %861 = vmatpush.msra.mxu2 %v217_v1  ;;  %880 = vmatpush.msra.mxu3 %v234_v2  ;;  %v267_v1 = vld [vmem:[#allocation6 + $0x6a8] sm:$0xff]  ;;  %v282_v2 = vld [vmem:[#allocation6 + $0x720] sm:$0xff] }
  0x6a   :  { %822 = vmatpush.msra.mxu0 %v184_v3  ;;  %841 = vmatpush.msra.mxu1 %v201_v4  ;;  %v299_v3 = vld [vmem:[#allocation6 + $0x7a8] sm:$0xff]  ;;  %v249_v4 = vld [vmem:[#allocation6 + $0x618] sm:$0xff] }
  0x6b   :  { %862 = vmatpush.msra.mxu2 %v216_v5  ;;  %881 = vmatpush.msra.mxu3 %v233_v6  ;;  %v266_v5 = vld [vmem:[#allocation6 + $0x6a0] sm:$0xff]  ;;  %v281_v6 = vld [vmem:[#allocation6 + $0x718] sm:$0xff] }
  0x6c   :  { %823 = vmatpush.msra.mxu0 %v183_v7  ;;  %842 = vmatpush.msra.mxu1 %v200_v8  ;;  %v298_v7 = vld [vmem:[#allocation6 + $0x7a0] sm:$0xff]  ;;  %v248_v8 = vld [vmem:[#allocation6 + $0x610] sm:$0xff] }
  0x6d   :  { %863 = vmatpush.msra.mxu2 %v215_v9  ;;  %882 = vmatpush.msra.mxu3 %v232_v10  ;;  %v265_v9 = vld [vmem:[#allocation6 + $0x698] sm:$0xff]  ;;  %v280_v10 = vld [vmem:[#allocation6 + $0x710] sm:$0xff] }
  0x6e   :  { %824 = vmatpush.msra.mxu0 %v182_v11  ;;  %843 = vmatpush.msra.mxu1 %v199_v12  ;;  %v297_v11 = vld [vmem:[#allocation6 + $0x798] sm:$0xff]  ;;  %v247_v12 = vld [vmem:[#allocation6 + $0x608] sm:$0xff] }
  0x6f   :  { %864 = vmatpush.msra.mxu2 %v214_v13  ;;  %883 = vmatpush.msra.mxu3 %v231_v14  ;;  %v264_v13 = vld [vmem:[#allocation6 + $0x690] sm:$0xff]  ;;  %v279_v14 = vld [vmem:[#allocation6 + $0x708] sm:$0xff] }
  0x70   :  { %825 = vmatmul.f32.vlgmr.msra.gmra.mxu0 %v1460_v26  ;;  %865 = vmatmul.f32.vlgmr.msra.gmra.mxu2 %v1462_v27  ;;  %v1476_v26 = vld.sshfl [vmem:[#allocation1 + $0x20] sm:$0xff pattern:$0x73625140]  ;;  %v1478_v27 = vld.sshfl [vmem:[#allocation1 + $0x30] sm:$0xff pattern:$0x73625140] }
  0x71   :  { %889 = vmatpush.msrb.mxu0 %v261_v15  ;;  %929 = vmatpush.msrb.mxu2 %v293_v16  ;;  %598 = vst [vmem:[#allocation1 + $0x20] ss:$4 sm:$0xff] %v51_v34  ;;  %v296_v15 = vld [vmem:[#allocation6 + $0x790] sm:$0xff]  ;;  %v246_v16 = vld [vmem:[#allocation6 + $0x600] sm:$0xff] }
  0x72   :  { %844 = vmatpush.msra.mxu1 %v198_v17  ;;  %884 = vmatpush.msra.mxu3 %v230_v18  ;;  %v263_v17 = vld [vmem:[#allocation6 + $0x688] sm:$0xff]  ;;  %v278_v18 = vld [vmem:[#allocation6 + $0x700] sm:$0xff]  ;;  %v340_v34 = vld [vmem:[#allocation6 + $0x8f0] sm:$0xff] }
  0x73   :  { %845 = vmatmul.f32.vlgmr.msra.gmra.mxu1 %v1464_v28  ;;  %885 = vmatmul.f32.vlgmr.msra.gmra.mxu3 %v1466_v31  ;;  %v290_v28 = vld [vmem:[#allocation6 + $0x760] sm:$0xff]  ;;  %v307_v31 = vld [vmem:[#allocation6 + $0x7e8] sm:$0xff] }
  0x74   :  { %890 = vmatpush.msrb.mxu0 %v260_v19  ;;  %909 = vmatpush.msrb.mxu1 %v277_v20  ;;  %v295_v19 = vld [vmem:[#allocation6 + $0x788] sm:$0xff]  ;;  %v325_v20 = vld [vmem:[#allocation6 + $0x878] sm:$0xff] }
  0x75   :  { %930 = vmatpush.msrb.mxu2 %v292_v21  ;;  %949 = vmatpush.msrb.mxu3 %v309_v22  ;;  %v357_v21 = vld [vmem:[#allocation6 + $0x978] sm:$0xff]  ;;  %v262_v22 = vld [vmem:[#allocation6 + $0x680] sm:$0xff] }
  0x76   :  { %891 = vmatpush.msrb.mxu0 %v259_v23  ;;  %910 = vmatpush.msrb.mxu1 %v276_v24  ;;  %v294_v23 = vld [vmem:[#allocation6 + $0x780] sm:$0xff]  ;;  %v324_v24 = vld [vmem:[#allocation6 + $0x870] sm:$0xff] }
  0x77   :  { %931 = vmatpush.msrb.mxu2 %v291_v25  ;;  %950 = vmatpush.msrb.mxu3 %v308_v29  ;;  %v341_v25 = vld [vmem:[#allocation6 + $0x8f8] sm:$0xff]  ;;  %v356_v29 = vld [vmem:[#allocation6 + $0x970] sm:$0xff] }
  0x78   :  { %892 = vmatpush.msrb.mxu0 %v258_v30  ;;  %911 = vmatpush.msrb.mxu1 %v275_v33  ;;  %v373_v30 = vld [vmem:[#allocation6 + $0x9f8] sm:$0xff]  ;;  %v323_v33 = vld [vmem:[#allocation6 + $0x868] sm:$0xff] }
  0x79   :  { %932 = vmatpush.msrb.mxu2 %v290_v28  ;;  %951 = vmatpush.msrb.mxu3 %v307_v31  ;;  %v355_v28 = vld [vmem:[#allocation6 + $0x968] sm:$0xff] }
  0x7a   :  { %893 = vmatpush.msrb.mxu0 %v257_v36  ;;  %912 = vmatpush.msrb.mxu1 %v274_v37  ;;  %v339_v31 = vld [vmem:[#allocation6 + $0x8e8] sm:$0xff]  ;;  %v354_v36 = vld [vmem:[#allocation6 + $0x960] sm:$0xff] }
  0x7b   :  { %933 = vmatpush.msrb.mxu2 %v289_v38  ;;  %952 = vmatpush.msrb.mxu3 %v306_v39  ;;  %v371_v37 = vld [vmem:[#allocation6 + $0x9e8] sm:$0xff]  ;;  %v321_v38 = vld [vmem:[#allocation6 + $0x858] sm:$0xff]  ;;  %v370_v39 = vld [vmem:[#allocation6 + $0x9e0] sm:$0xff] }
  0x7c   :  { %894 = vmatpush.msrb.mxu0 %v256_v40  ;;  %913 = vmatpush.msrb.mxu1 %v273_v41  ;;  %v320_v40 = vld [vmem:[#allocation6 + $0x850] sm:$0xff]  ;;  %v337_v41 = vld [vmem:[#allocation6 + $0x8d8] sm:$0xff] }
  0x7d   :  { %934 = vmatpush.msrb.mxu2 %v288_v42  ;;  %953 = vmatpush.msrb.mxu3 %v305_v43  ;;  %v352_v42 = vld [vmem:[#allocation6 + $0x950] sm:$0xff]  ;;  %v369_v43 = vld [vmem:[#allocation6 + $0x9d8] sm:$0xff] }
  0x7e   :  { %895 = vmatpush.msrb.mxu0 %v255_v44  ;;  %914 = vmatpush.msrb.mxu1 %v272_v45  ;;  %v319_v44 = vld [vmem:[#allocation6 + $0x848] sm:$0xff]  ;;  %v336_v45 = vld [vmem:[#allocation6 + $0x8d0] sm:$0xff] }
  0x7f   :  { %935 = vmatpush.msrb.mxu2 %v287_v46  ;;  %954 = vmatpush.msrb.mxu3 %v304_v47  ;;  %v351_v46 = vld [vmem:[#allocation6 + $0x948] sm:$0xff]  ;;  %v368_v47 = vld [vmem:[#allocation6 + $0x9d0] sm:$0xff] }
  0x80   :  { %896 = vmatpush.msrb.mxu0 %v254_v48  ;;  %915 = vmatpush.msrb.mxu1 %v271_v49  ;;  %v318_v48 = vld [vmem:[#allocation6 + $0x840] sm:$0xff]  ;;  %v335_v49 = vld [vmem:[#allocation6 + $0x8c8] sm:$0xff] }
  0x81   :  { %936 = vmatpush.msrb.mxu2 %v286_v50  ;;  %955 = vmatpush.msrb.mxu3 %v303_v51  ;;  %v350_v50 = vld [vmem:[#allocation6 + $0x940] sm:$0xff]  ;;  %v367_v51 = vld [vmem:[#allocation6 + $0x9c8] sm:$0xff] }
  0x82   :  { %897 = vmatpush.msrb.mxu0 %v253_v52  ;;  %916 = vmatpush.msrb.mxu1 %v270_v53  ;;  %v317_v52 = vld [vmem:[#allocation6 + $0x838] sm:$0xff]  ;;  %v334_v53 = vld [vmem:[#allocation6 + $0x8c0] sm:$0xff] }
  0x83   :  { %937 = vmatpush.msrb.mxu2 %v285_v54  ;;  %956 = vmatpush.msrb.mxu3 %v302_v55  ;;  %v349_v54 = vld [vmem:[#allocation6 + $0x938] sm:$0xff]  ;;  %v366_v55 = vld [vmem:[#allocation6 + $0x9c0] sm:$0xff] }
  0x84   :  { %898 = vmatpush.msrb.mxu0 %v252_v56  ;;  %917 = vmatpush.msrb.mxu1 %v269_v57  ;;  %v316_v56 = vld [vmem:[#allocation6 + $0x830] sm:$0xff]  ;;  %v333_v57 = vld [vmem:[#allocation6 + $0x8b8] sm:$0xff] }
  0x85   :  { %938 = vmatpush.msrb.mxu2 %v284_v58  ;;  %957 = vmatpush.msrb.mxu3 %v301_v59  ;;  %v348_v58 = vld [vmem:[#allocation6 + $0x930] sm:$0xff]  ;;  %v365_v59 = vld [vmem:[#allocation6 + $0x9b8] sm:$0xff] }
  0x86   :  { %899 = vmatpush.msrb.mxu0 %v251_v60  ;;  %918 = vmatpush.msrb.mxu1 %v268_v61  ;;  %v315_v60 = vld [vmem:[#allocation6 + $0x828] sm:$0xff]  ;;  %v332_v61 = vld [vmem:[#allocation6 + $0x8b0] sm:$0xff] }
  0x87   :  { %939 = vmatpush.msrb.mxu2 %v283_v62  ;;  %958 = vmatpush.msrb.mxu3 %v300_v63  ;;  %v347_v62 = vld [vmem:[#allocation6 + $0x928] sm:$0xff]  ;;  %v364_v63 = vld [vmem:[#allocation6 + $0x9b0] sm:$0xff] }
  0x88   :  { %900 = vmatpush.msrb.mxu0 %v250_v0  ;;  %919 = vmatpush.msrb.mxu1 %v267_v1  ;;  %v314_v0 = vld [vmem:[#allocation6 + $0x820] sm:$0xff]  ;;  %v331_v1 = vld [vmem:[#allocation6 + $0x8a8] sm:$0xff] }
  0x89   :  { %940 = vmatpush.msrb.mxu2 %v282_v2  ;;  %959 = vmatpush.msrb.mxu3 %v299_v3  ;;  %v346_v2 = vld [vmem:[#allocation6 + $0x920] sm:$0xff]  ;;  %v363_v3 = vld [vmem:[#allocation6 + $0x9a8] sm:$0xff] }
  0x8a   :  { %901 = vmatpush.msrb.mxu0 %v249_v4  ;;  %920 = vmatpush.msrb.mxu1 %v266_v5  ;;  %v313_v4 = vld [vmem:[#allocation6 + $0x818] sm:$0xff]  ;;  %v330_v5 = vld [vmem:[#allocation6 + $0x8a0] sm:$0xff] }
  0x8b   :  { %941 = vmatpush.msrb.mxu2 %v281_v6  ;;  %960 = vmatpush.msrb.mxu3 %v298_v7  ;;  %v345_v6 = vld [vmem:[#allocation6 + $0x918] sm:$0xff]  ;;  %v362_v7 = vld [vmem:[#allocation6 + $0x9a0] sm:$0xff] }
  0x8c   :  { %902 = vmatpush.msrb.mxu0 %v248_v8  ;;  %921 = vmatpush.msrb.mxu1 %v265_v9  ;;  %v312_v8 = vld [vmem:[#allocation6 + $0x810] sm:$0xff]  ;;  %v329_v9 = vld [vmem:[#allocation6 + $0x898] sm:$0xff] }
  0x8d   :  { %942 = vmatpush.msrb.mxu2 %v280_v10  ;;  %961 = vmatpush.msrb.mxu3 %v297_v11  ;;  %v344_v10 = vld [vmem:[#allocation6 + $0x910] sm:$0xff]  ;;  %v361_v11 = vld [vmem:[#allocation6 + $0x998] sm:$0xff] }
  0x8e   :  { %903 = vmatpush.msrb.mxu0 %v247_v12  ;;  %922 = vmatpush.msrb.mxu1 %v264_v13  ;;  %v311_v12 = vld [vmem:[#allocation6 + $0x808] sm:$0xff]  ;;  %v328_v13 = vld [vmem:[#allocation6 + $0x890] sm:$0xff] }
  0x8f   :  { %943 = vmatpush.msrb.mxu2 %v279_v14  ;;  %962 = vmatpush.msrb.mxu3 %v296_v15  ;;  %v343_v14 = vld [vmem:[#allocation6 + $0x908] sm:$0xff]  ;;  %v360_v15 = vld [vmem:[#allocation6 + $0x990] sm:$0xff] }
  0x90   :  { %904 = vmatpush.msrb.mxu0 %v246_v16  ;;  %923 = vmatpush.msrb.mxu1 %v263_v17  ;;  %v310_v16 = vld [vmem:[#allocation6 + $0x800] sm:$0xff]  ;;  %v327_v17 = vld [vmem:[#allocation6 + $0x888] sm:$0xff] }
  0x91   :  { %944 = vmatpush.msrb.mxu2 %v278_v18  ;;  %963 = vmatpush.msrb.mxu3 %v295_v19  ;;  %v342_v18 = vld [vmem:[#allocation6 + $0x900] sm:$0xff]  ;;  %v359_v19 = vld [vmem:[#allocation6 + $0x988] sm:$0xff] }
  0x92   :  { %905 = vmatmul.f32.vlgmr.msrb.gmra.mxu0 %v1476_v26  ;;  %945 = vmatmul.f32.vlgmr.msrb.gmra.mxu2 %v1478_v27  ;;  %v372_v26 = vld [vmem:[#allocation6 + $0x9f0] sm:$0xff]  ;;  %v322_v27 = vld [vmem:[#allocation6 + $0x860] sm:$0xff] }
  0x93   :  { %969 = vmatpush.msra.mxu0 %v325_v20  ;;  %1009 = vmatpush.msra.mxu2 %v357_v21  ;;  %v599_v20 = vld.sshfl [vmem:[#allocation1] sm:$0xff pattern:$0x73625140]  ;;  %v601_v21 = vld.sshfl [vmem:[#allocation1 + $0x10] sm:$0xff pattern:$0x73625140] }
  0x94   :  { %924 = vmatpush.msrb.mxu1 %v262_v22  ;;  %964 = vmatpush.msrb.mxu3 %v294_v23  ;;  %v389_v22 = vld [vmem:[#allocation6 + $0xa78] sm:$0xff] }
  0x95   :  { %925 = vmatmul.f32.vlgmr.msrb.gmra.mxu1 %v1480_v32  ;;  %965 = vmatmul.f32.vlgmr.msrb.gmra.mxu3 %v1482_v35  ;;  %v338_v32 = vld [vmem:[#allocation6 + $0x8e0] sm:$0xff]  ;;  %v353_v35 = vld [vmem:[#allocation6 + $0x958] sm:$0xff] }
  0x96   :  { %970 = vmatpush.msra.mxu0 %v324_v24  ;;  %989 = vmatpush.msra.mxu1 %v341_v25  ;;  %v421_v23 = vld [vmem:[#allocation6 + $0xb78] sm:$0xff]  ;;  %v326_v24 = vld [vmem:[#allocation6 + $0x880] sm:$0xff] }
  0x97   :  { %1010 = vmatpush.msra.mxu2 %v356_v29  ;;  %1029 = vmatpush.msra.mxu3 %v373_v30  ;;  %v358_v25 = vld [vmem:[#allocation6 + $0x980] sm:$0xff]  ;;  %v602_v30 = vld.sshfl [vmem:[#allocation1 + $0x18] sm:$0xff pattern:$0x73625140] }
  0x98   :  { %971 = vmatpush.msra.mxu0 %v323_v33  ;;  %990 = vmatpush.msra.mxu1 %v340_v34  ;;  %v600_v29 = vld.sshfl [vmem:[#allocation1 + $0x8] sm:$0xff pattern:$0x73625140]  ;;  %v388_v33 = vld [vmem:[#allocation6 + $0xa70] sm:$0xff]  ;;  %v405_v34 = vld [vmem:[#allocation6 + $0xaf8] sm:$0xff] }
  0x99   :  { %1011 = vmatpush.msra.mxu2 %v355_v28  ;;  %1030 = vmatpush.msra.mxu3 %v372_v26  ;;  %v420_v28 = vld [vmem:[#allocation6 + $0xb70] sm:$0xff]  ;;  %v437_v26 = vld [vmem:[#allocation6 + $0xbf8] sm:$0xff] }
  0x9a   :  { %972 = vmatpush.msra.mxu0 %v322_v27  ;;  %991 = vmatpush.msra.mxu1 %v339_v31  ;;  %v387_v27 = vld [vmem:[#allocation6 + $0xa68] sm:$0xff]  ;;  %v404_v31 = vld [vmem:[#allocation6 + $0xaf0] sm:$0xff] }
  0x9b   :  { %1012 = vmatpush.msra.mxu2 %v354_v36  ;;  %1031 = vmatpush.msra.mxu3 %v371_v37  ;;  %v419_v36 = vld [vmem:[#allocation6 + $0xb68] sm:$0xff]  ;;  %v436_v37 = vld [vmem:[#allocation6 + $0xbf0] sm:$0xff] }
  0x9c   :  { %973 = vmatpush.msra.mxu0 %v321_v38  ;;  %992 = vmatpush.msra.mxu1 %v338_v32  ;;  %v386_v38 = vld [vmem:[#allocation6 + $0xa60] sm:$0xff]  ;;  %v403_v32 = vld [vmem:[#allocation6 + $0xae8] sm:$0xff] }
  0x9d   :  { %1013 = vmatpush.msra.mxu2 %v353_v35  ;;  %1032 = vmatpush.msra.mxu3 %v370_v39  ;;  %v418_v35 = vld [vmem:[#allocation6 + $0xb60] sm:$0xff]  ;;  %v435_v39 = vld [vmem:[#allocation6 + $0xbe8] sm:$0xff] }
  0x9e   :  { %974 = vmatpush.msra.mxu0 %v320_v40  ;;  %993 = vmatpush.msra.mxu1 %v337_v41  ;;  %v385_v40 = vld [vmem:[#allocation6 + $0xa58] sm:$0xff]  ;;  %v402_v41 = vld [vmem:[#allocation6 + $0xae0] sm:$0xff] }
  0x9f   :  { %1014 = vmatpush.msra.mxu2 %v352_v42  ;;  %1033 = vmatpush.msra.mxu3 %v369_v43  ;;  %v417_v42 = vld [vmem:[#allocation6 + $0xb58] sm:$0xff]  ;;  %v434_v43 = vld [vmem:[#allocation6 + $0xbe0] sm:$0xff] }
  0xa0   :  { %975 = vmatpush.msra.mxu0 %v319_v44  ;;  %994 = vmatpush.msra.mxu1 %v336_v45  ;;  %v384_v44 = vld [vmem:[#allocation6 + $0xa50] sm:$0xff]  ;;  %v401_v45 = vld [vmem:[#allocation6 + $0xad8] sm:$0xff] }
  0xa1   :  { %1015 = vmatpush.msra.mxu2 %v351_v46  ;;  %1034 = vmatpush.msra.mxu3 %v368_v47  ;;  %v416_v46 = vld [vmem:[#allocation6 + $0xb50] sm:$0xff]  ;;  %v433_v47 = vld [vmem:[#allocation6 + $0xbd8] sm:$0xff] }
  0xa2   :  { %976 = vmatpush.msra.mxu0 %v318_v48  ;;  %995 = vmatpush.msra.mxu1 %v335_v49  ;;  %v383_v48 = vld [vmem:[#allocation6 + $0xa48] sm:$0xff]  ;;  %v400_v49 = vld [vmem:[#allocation6 + $0xad0] sm:$0xff] }
  0xa3   :  { %1016 = vmatpush.msra.mxu2 %v350_v50  ;;  %1035 = vmatpush.msra.mxu3 %v367_v51  ;;  %v415_v50 = vld [vmem:[#allocation6 + $0xb48] sm:$0xff]  ;;  %v432_v51 = vld [vmem:[#allocation6 + $0xbd0] sm:$0xff] }
  0xa4   :  { %977 = vmatpush.msra.mxu0 %v317_v52  ;;  %996 = vmatpush.msra.mxu1 %v334_v53  ;;  %v382_v52 = vld [vmem:[#allocation6 + $0xa40] sm:$0xff]  ;;  %v399_v53 = vld [vmem:[#allocation6 + $0xac8] sm:$0xff] }
  0xa5   :  { %1017 = vmatpush.msra.mxu2 %v349_v54  ;;  %1036 = vmatpush.msra.mxu3 %v366_v55  ;;  %v414_v54 = vld [vmem:[#allocation6 + $0xb40] sm:$0xff]  ;;  %v431_v55 = vld [vmem:[#allocation6 + $0xbc8] sm:$0xff] }
  0xa6   :  { %978 = vmatpush.msra.mxu0 %v316_v56  ;;  %997 = vmatpush.msra.mxu1 %v333_v57  ;;  %v381_v56 = vld [vmem:[#allocation6 + $0xa38] sm:$0xff]  ;;  %v398_v57 = vld [vmem:[#allocation6 + $0xac0] sm:$0xff] }
  0xa7   :  { %1018 = vmatpush.msra.mxu2 %v348_v58  ;;  %1037 = vmatpush.msra.mxu3 %v365_v59  ;;  %v413_v58 = vld [vmem:[#allocation6 + $0xb38] sm:$0xff]  ;;  %v430_v59 = vld [vmem:[#allocation6 + $0xbc0] sm:$0xff] }
  0xa8   :  { %979 = vmatpush.msra.mxu0 %v315_v60  ;;  %998 = vmatpush.msra.mxu1 %v332_v61  ;;  %v380_v60 = vld [vmem:[#allocation6 + $0xa30] sm:$0xff]  ;;  %v397_v61 = vld [vmem:[#allocation6 + $0xab8] sm:$0xff] }
  0xa9   :  { %1019 = vmatpush.msra.mxu2 %v347_v62  ;;  %1038 = vmatpush.msra.mxu3 %v364_v63  ;;  %v412_v62 = vld [vmem:[#allocation6 + $0xb30] sm:$0xff]  ;;  %v429_v63 = vld [vmem:[#allocation6 + $0xbb8] sm:$0xff] }
  0xaa   :  { %980 = vmatpush.msra.mxu0 %v314_v0  ;;  %999 = vmatpush.msra.mxu1 %v331_v1  ;;  %v379_v0 = vld [vmem:[#allocation6 + $0xa28] sm:$0xff]  ;;  %v396_v1 = vld [vmem:[#allocation6 + $0xab0] sm:$0xff] }
  0xab   :  { %1020 = vmatpush.msra.mxu2 %v346_v2  ;;  %1039 = vmatpush.msra.mxu3 %v363_v3  ;;  %v411_v2 = vld [vmem:[#allocation6 + $0xb28] sm:$0xff]  ;;  %v428_v3 = vld [vmem:[#allocation6 + $0xbb0] sm:$0xff] }
  0xac   :  { %981 = vmatpush.msra.mxu0 %v313_v4  ;;  %1000 = vmatpush.msra.mxu1 %v330_v5  ;;  %v378_v4 = vld [vmem:[#allocation6 + $0xa20] sm:$0xff]  ;;  %v395_v5 = vld [vmem:[#allocation6 + $0xaa8] sm:$0xff] }
  0xad   :  { %1021 = vmatpush.msra.mxu2 %v345_v6  ;;  %1040 = vmatpush.msra.mxu3 %v362_v7  ;;  %v410_v6 = vld [vmem:[#allocation6 + $0xb20] sm:$0xff]  ;;  %v427_v7 = vld [vmem:[#allocation6 + $0xba8] sm:$0xff] }
  0xae   :  { %982 = vmatpush.msra.mxu0 %v312_v8  ;;  %1001 = vmatpush.msra.mxu1 %v329_v9  ;;  %v377_v8 = vld [vmem:[#allocation6 + $0xa18] sm:$0xff]  ;;  %v394_v9 = vld [vmem:[#allocation6 + $0xaa0] sm:$0xff] }
  0xaf   :  { %1022 = vmatpush.msra.mxu2 %v344_v10  ;;  %1041 = vmatpush.msra.mxu3 %v361_v11  ;;  %v409_v10 = vld [vmem:[#allocation6 + $0xb18] sm:$0xff]  ;;  %v426_v11 = vld [vmem:[#allocation6 + $0xba0] sm:$0xff] }
  0xb0   :  { %983 = vmatpush.msra.mxu0 %v311_v12  ;;  %1002 = vmatpush.msra.mxu1 %v328_v13  ;;  %v376_v12 = vld [vmem:[#allocation6 + $0xa10] sm:$0xff]  ;;  %v393_v13 = vld [vmem:[#allocation6 + $0xa98] sm:$0xff] }
  0xb1   :  { %1023 = vmatpush.msra.mxu2 %v343_v14  ;;  %1042 = vmatpush.msra.mxu3 %v360_v15  ;;  %v408_v14 = vld [vmem:[#allocation6 + $0xb10] sm:$0xff]  ;;  %v425_v15 = vld [vmem:[#allocation6 + $0xb98] sm:$0xff] }
  0xb2   :  { %984 = vmatpush.msra.mxu0 %v310_v16  ;;  %1003 = vmatpush.msra.mxu1 %v327_v17  ;;  %v375_v16 = vld [vmem:[#allocation6 + $0xa08] sm:$0xff]  ;;  %v392_v17 = vld [vmem:[#allocation6 + $0xa90] sm:$0xff] }
  0xb3   :  { %1024 = vmatpush.msra.mxu2 %v342_v18  ;;  %1043 = vmatpush.msra.mxu3 %v359_v19  ;;  %v52_v18 = vld [vmem:[#allocation3 + $0x30] sm:$0xff]  ;;  %v407_v19 = vld [vmem:[#allocation6 + $0xb08] sm:$0xff] }
  0xb4   :  { %985 = vmatmul.f32.vlgmr.msra.gmra.mxu0 %v599_v20  ;;  %1025 = vmatmul.f32.vlgmr.msra.gmra.mxu2 %v601_v21  ;;  %v424_v20 = vld [vmem:[#allocation6 + $0xb90] sm:$0xff]  ;;  %607 = vst [vmem:[#allocation1] ss:$4 sm:$0xff] %v52_v18  ;;  %v374_v21 = vld [vmem:[#allocation6 + $0xa00] sm:$0xff]  ;;  %v457_v18 = vld [vmem:[#allocation6 + $0xc98] sm:$0xff] }
  0xb5   :  { %1049 = vmatpush.msrb.mxu0 %v389_v22  ;;  %1089 = vmatpush.msrb.mxu2 %v421_v23  ;;  %v391_v22 = vld [vmem:[#allocation6 + $0xa88] sm:$0xff]  ;;  %v406_v23 = vld [vmem:[#allocation6 + $0xb00] sm:$0xff] }
  0xb6   :  { %1004 = vmatpush.msra.mxu1 %v326_v24  ;;  %1044 = vmatpush.msra.mxu3 %v358_v25  ;;  %v423_v24 = vld [vmem:[#allocation6 + $0xb88] sm:$0xff]  ;;  %v603_v25 = vld.sshfl [vmem:[#allocation1 + $0x20] sm:$0xff pattern:$0x73625140] }
  0xb7   :  { %1005 = vmatmul.f32.vlgmr.msra.gmra.mxu1 %v600_v29  ;;  %1045 = vmatmul.f32.vlgmr.msra.gmra.mxu3 %v602_v30  ;;  %v605_v29 = vld.sshfl [vmem:[#allocation1 + $0x30] sm:$0xff pattern:$0x73625140]  ;;  %v453_v30 = vld [vmem:[#allocation6 + $0xc78] sm:$0xff] }
  0xb8   :  { %1050 = vmatpush.msrb.mxu0 %v388_v33  ;;  %1069 = vmatpush.msrb.mxu1 %v405_v34  ;;  %v485_v33 = vld [vmem:[#allocation6 + $0xd78] sm:$0xff]  ;;  %v390_v34 = vld [vmem:[#allocation6 + $0xa80] sm:$0xff] }
  0xb9   :  { %1090 = vmatpush.msrb.mxu2 %v420_v28  ;;  %1109 = vmatpush.msrb.mxu3 %v437_v26  ;;  %v422_v28 = vld [vmem:[#allocation6 + $0xb80] sm:$0xff] }
  0xba   :  { %1051 = vmatpush.msrb.mxu0 %v387_v27  ;;  %1070 = vmatpush.msrb.mxu1 %v404_v31  ;;  %v604_v26 = vld.sshfl [vmem:[#allocation1 + $0x28] sm:$0xff pattern:$0x73625140]  ;;  %v606_v27 = vld.sshfl [vmem:[#allocation1 + $0x38] sm:$0xff pattern:$0x73625140] }
  0xbb   :  { %1091 = vmatpush.msrb.mxu2 %v419_v36  ;;  %1110 = vmatpush.msrb.mxu3 %v436_v37  ;;  %v452_v31 = vld [vmem:[#allocation6 + $0xc70] sm:$0xff]  ;;  %v469_v36 = vld [vmem:[#allocation6 + $0xcf8] sm:$0xff] }
  0xbc   :  { %1052 = vmatpush.msrb.mxu0 %v386_v38  ;;  %1071 = vmatpush.msrb.mxu1 %v403_v32  ;;  %v484_v37 = vld [vmem:[#allocation6 + $0xd70] sm:$0xff]  ;;  %v501_v38 = vld [vmem:[#allocation6 + $0xdf8] sm:$0xff]  ;;  %v451_v32 = vld [vmem:[#allocation6 + $0xc68] sm:$0xff] }
  0xbd   :  { %1092 = vmatpush.msrb.mxu2 %v418_v35  ;;  %1111 = vmatpush.msrb.mxu3 %v435_v39  ;;  %v468_v35 = vld [vmem:[#allocation6 + $0xcf0] sm:$0xff]  ;;  %v483_v39 = vld [vmem:[#allocation6 + $0xd68] sm:$0xff] }
  0xbe   :  { %1053 = vmatpush.msrb.mxu0 %v385_v40  ;;  %1072 = vmatpush.msrb.mxu1 %v402_v41  ;;  %v500_v40 = vld [vmem:[#allocation6 + $0xdf0] sm:$0xff]  ;;  %v450_v41 = vld [vmem:[#allocation6 + $0xc60] sm:$0xff] }
  0xbf   :  { %1093 = vmatpush.msrb.mxu2 %v417_v42  ;;  %1112 = vmatpush.msrb.mxu3 %v434_v43  ;;  %v467_v42 = vld [vmem:[#allocation6 + $0xce8] sm:$0xff]  ;;  %v482_v43 = vld [vmem:[#allocation6 + $0xd60] sm:$0xff] }
  0xc0   :  { %1054 = vmatpush.msrb.mxu0 %v384_v44  ;;  %1073 = vmatpush.msrb.mxu1 %v401_v45  ;;  %v499_v44 = vld [vmem:[#allocation6 + $0xde8] sm:$0xff]  ;;  %v449_v45 = vld [vmem:[#allocation6 + $0xc58] sm:$0xff] }
  0xc1   :  { %1094 = vmatpush.msrb.mxu2 %v416_v46  ;;  %1113 = vmatpush.msrb.mxu3 %v433_v47  ;;  %v466_v46 = vld [vmem:[#allocation6 + $0xce0] sm:$0xff]  ;;  %v481_v47 = vld [vmem:[#allocation6 + $0xd58] sm:$0xff] }
  0xc2   :  { %1055 = vmatpush.msrb.mxu0 %v383_v48  ;;  %1074 = vmatpush.msrb.mxu1 %v400_v49  ;;  %v498_v48 = vld [vmem:[#allocation6 + $0xde0] sm:$0xff]  ;;  %v448_v49 = vld [vmem:[#allocation6 + $0xc50] sm:$0xff] }
  0xc3   :  { %1095 = vmatpush.msrb.mxu2 %v415_v50  ;;  %1114 = vmatpush.msrb.mxu3 %v432_v51  ;;  %v465_v50 = vld [vmem:[#allocation6 + $0xcd8] sm:$0xff]  ;;  %v480_v51 = vld [vmem:[#allocation6 + $0xd50] sm:$0xff] }
  0xc4   :  { %1056 = vmatpush.msrb.mxu0 %v382_v52  ;;  %1075 = vmatpush.msrb.mxu1 %v399_v53  ;;  %v497_v52 = vld [vmem:[#allocation6 + $0xdd8] sm:$0xff]  ;;  %v447_v53 = vld [vmem:[#allocation6 + $0xc48] sm:$0xff] }
  0xc5   :  { %1096 = vmatpush.msrb.mxu2 %v414_v54  ;;  %1115 = vmatpush.msrb.mxu3 %v431_v55  ;;  %v464_v54 = vld [vmem:[#allocation6 + $0xcd0] sm:$0xff]  ;;  %v479_v55 = vld [vmem:[#allocation6 + $0xd48] sm:$0xff] }
  0xc6   :  { %1057 = vmatpush.msrb.mxu0 %v381_v56  ;;  %1076 = vmatpush.msrb.mxu1 %v398_v57  ;;  %v496_v56 = vld [vmem:[#allocation6 + $0xdd0] sm:$0xff]  ;;  %v446_v57 = vld [vmem:[#allocation6 + $0xc40] sm:$0xff] }
  0xc7   :  { %1097 = vmatpush.msrb.mxu2 %v413_v58  ;;  %1116 = vmatpush.msrb.mxu3 %v430_v59  ;;  %v463_v58 = vld [vmem:[#allocation6 + $0xcc8] sm:$0xff]  ;;  %v478_v59 = vld [vmem:[#allocation6 + $0xd40] sm:$0xff] }
  0xc8   :  { %1058 = vmatpush.msrb.mxu0 %v380_v60  ;;  %1077 = vmatpush.msrb.mxu1 %v397_v61  ;;  %v495_v60 = vld [vmem:[#allocation6 + $0xdc8] sm:$0xff]  ;;  %v445_v61 = vld [vmem:[#allocation6 + $0xc38] sm:$0xff] }
  0xc9   :  { %1098 = vmatpush.msrb.mxu2 %v412_v62  ;;  %1117 = vmatpush.msrb.mxu3 %v429_v63  ;;  %v462_v62 = vld [vmem:[#allocation6 + $0xcc0] sm:$0xff]  ;;  %v477_v63 = vld [vmem:[#allocation6 + $0xd38] sm:$0xff] }
  0xca   :  { %1059 = vmatpush.msrb.mxu0 %v379_v0  ;;  %1078 = vmatpush.msrb.mxu1 %v396_v1  ;;  %v494_v0 = vld [vmem:[#allocation6 + $0xdc0] sm:$0xff]  ;;  %v444_v1 = vld [vmem:[#allocation6 + $0xc30] sm:$0xff] }
  0xcb   :  { %1099 = vmatpush.msrb.mxu2 %v411_v2  ;;  %1118 = vmatpush.msrb.mxu3 %v428_v3  ;;  %v461_v2 = vld [vmem:[#allocation6 + $0xcb8] sm:$0xff]  ;;  %v476_v3 = vld [vmem:[#allocation6 + $0xd30] sm:$0xff] }
  0xcc   :  { %1060 = vmatpush.msrb.mxu0 %v378_v4  ;;  %1079 = vmatpush.msrb.mxu1 %v395_v5  ;;  %v493_v4 = vld [vmem:[#allocation6 + $0xdb8] sm:$0xff]  ;;  %v443_v5 = vld [vmem:[#allocation6 + $0xc28] sm:$0xff] }
  0xcd   :  { %1100 = vmatpush.msrb.mxu2 %v410_v6  ;;  %1119 = vmatpush.msrb.mxu3 %v427_v7  ;;  %v460_v6 = vld [vmem:[#allocation6 + $0xcb0] sm:$0xff]  ;;  %v475_v7 = vld [vmem:[#allocation6 + $0xd28] sm:$0xff] }
  0xce   :  { %1061 = vmatpush.msrb.mxu0 %v377_v8  ;;  %1080 = vmatpush.msrb.mxu1 %v394_v9  ;;  %v492_v8 = vld [vmem:[#allocation6 + $0xdb0] sm:$0xff]  ;;  %v442_v9 = vld [vmem:[#allocation6 + $0xc20] sm:$0xff] }
  0xcf   :  { %1101 = vmatpush.msrb.mxu2 %v409_v10  ;;  %1120 = vmatpush.msrb.mxu3 %v426_v11  ;;  %v459_v10 = vld [vmem:[#allocation6 + $0xca8] sm:$0xff]  ;;  %v474_v11 = vld [vmem:[#allocation6 + $0xd20] sm:$0xff] }
  0xd0   :  { %1062 = vmatpush.msrb.mxu0 %v376_v12  ;;  %1081 = vmatpush.msrb.mxu1 %v393_v13  ;;  %v491_v12 = vld [vmem:[#allocation6 + $0xda8] sm:$0xff]  ;;  %v441_v13 = vld [vmem:[#allocation6 + $0xc18] sm:$0xff] }
  0xd1   :  { %1102 = vmatpush.msrb.mxu2 %v408_v14  ;;  %1121 = vmatpush.msrb.mxu3 %v425_v15  ;;  %v458_v14 = vld [vmem:[#allocation6 + $0xca0] sm:$0xff]  ;;  %v473_v15 = vld [vmem:[#allocation6 + $0xd18] sm:$0xff] }
  0xd2   :  { %1063 = vmatpush.msrb.mxu0 %v375_v16  ;;  %1082 = vmatpush.msrb.mxu1 %v392_v17  ;;  %v490_v16 = vld [vmem:[#allocation6 + $0xda0] sm:$0xff]  ;;  %v440_v17 = vld [vmem:[#allocation6 + $0xc10] sm:$0xff] }
  0xd3   :  { %1103 = vmatpush.msrb.mxu2 %v407_v19  ;;  %1122 = vmatpush.msrb.mxu3 %v424_v20  ;;  %v472_v19 = vld [vmem:[#allocation6 + $0xd10] sm:$0xff]  ;;  %v489_v20 = vld [vmem:[#allocation6 + $0xd98] sm:$0xff] }
  0xd4   :  { %1064 = vmatpush.msrb.mxu0 %v374_v21  ;;  %1083 = vmatpush.msrb.mxu1 %v391_v22  ;;  %v439_v21 = vld [vmem:[#allocation6 + $0xc08] sm:$0xff]  ;;  %v456_v22 = vld [vmem:[#allocation6 + $0xc90] sm:$0xff] }
  0xd5   :  { %1104 = vmatpush.msrb.mxu2 %v406_v23  ;;  %1123 = vmatpush.msrb.mxu3 %v423_v24  ;;  %v53_v23 = vld [vmem:[#allocation3 + $0x38] sm:$0xff]  ;;  %v471_v24 = vld [vmem:[#allocation6 + $0xd08] sm:$0xff] }
  0xd6   :  { %1065 = vmatmul.f32.vlgmr.msrb.gmra.mxu0 %v603_v25  ;;  %1105 = vmatmul.f32.vlgmr.msrb.gmra.mxu2 %v605_v29  ;;  %v488_v25 = vld [vmem:[#allocation6 + $0xd90] sm:$0xff]  ;;  %608 = vst [vmem:[#allocation1 + $0x20] ss:$4 sm:$0xff] %v53_v23  ;;  %v438_v29 = vld [vmem:[#allocation6 + $0xc00] sm:$0xff]  ;;  %v521_v23 = vld [vmem:[#allocation6 + $0xe98] sm:$0xff] }
  0xd7   :  { %1129 = vmatpush.msra.mxu0 %v453_v30  ;;  %1169 = vmatpush.msra.mxu2 %v485_v33  ;;  %v455_v30 = vld [vmem:[#allocation6 + $0xc88] sm:$0xff]  ;;  %v470_v33 = vld [vmem:[#allocation6 + $0xd00] sm:$0xff] }
  0xd8   :  { %1084 = vmatpush.msrb.mxu1 %v390_v34  ;;  %1124 = vmatpush.msrb.mxu3 %v422_v28  ;;  %v487_v34 = vld [vmem:[#allocation6 + $0xd88] sm:$0xff]  ;;  %v609_v28 = vld.sshfl [vmem:[#allocation1] sm:$0xff pattern:$0x73625140] }
  0xd9   :  { %1085 = vmatmul.f32.vlgmr.msrb.gmra.mxu1 %v604_v26  ;;  %1125 = vmatmul.f32.vlgmr.msrb.gmra.mxu3 %v606_v27  ;;  %v611_v26 = vld.sshfl [vmem:[#allocation1 + $0x10] sm:$0xff pattern:$0x73625140]  ;;  %v517_v27 = vld [vmem:[#allocation6 + $0xe78] sm:$0xff] }
  0xda   :  { %1130 = vmatpush.msra.mxu0 %v452_v31  ;;  %1149 = vmatpush.msra.mxu1 %v469_v36  ;;  %v549_v31 = vld [vmem:[#allocation6 + $0xf78] sm:$0xff]  ;;  %v454_v36 = vld [vmem:[#allocation6 + $0xc80] sm:$0xff] }
  0xdb   :  { %1170 = vmatpush.msra.mxu2 %v484_v37  ;;  %1189 = vmatpush.msra.mxu3 %v501_v38  ;;  %v486_v37 = vld [vmem:[#allocation6 + $0xd80] sm:$0xff] }
  0xdc   :  { %1131 = vmatpush.msra.mxu0 %v451_v32  ;;  %1150 = vmatpush.msra.mxu1 %v468_v35  ;;  %v610_v38 = vld.sshfl [vmem:[#allocation1 + $0x8] sm:$0xff pattern:$0x73625140]  ;;  %v612_v32 = vld.sshfl [vmem:[#allocation1 + $0x18] sm:$0xff pattern:$0x73625140] }
  0xdd   :  { %1171 = vmatpush.msra.mxu2 %v483_v39  ;;  %1190 = vmatpush.msra.mxu3 %v500_v40  ;;  %v516_v35 = vld [vmem:[#allocation6 + $0xe70] sm:$0xff]  ;;  %v533_v39 = vld [vmem:[#allocation6 + $0xef8] sm:$0xff] }
  0xde   :  { %1132 = vmatpush.msra.mxu0 %v450_v41  ;;  %1151 = vmatpush.msra.mxu1 %v467_v42  ;;  %v548_v40 = vld [vmem:[#allocation6 + $0xf70] sm:$0xff]  ;;  %v565_v41 = vld [vmem:[#allocation6 + $0xff8] sm:$0xff]  ;;  %v515_v42 = vld [vmem:[#allocation6 + $0xe68] sm:$0xff] }
  0xdf   :  { %1172 = vmatpush.msra.mxu2 %v482_v43  ;;  %1191 = vmatpush.msra.mxu3 %v499_v44  ;;  %v532_v43 = vld [vmem:[#allocation6 + $0xef0] sm:$0xff]  ;;  %v547_v44 = vld [vmem:[#allocation6 + $0xf68] sm:$0xff] }
  0xe0   :  { %1133 = vmatpush.msra.mxu0 %v449_v45  ;;  %1152 = vmatpush.msra.mxu1 %v466_v46  ;;  %v564_v45 = vld [vmem:[#allocation6 + $0xff0] sm:$0xff]  ;;  %v514_v46 = vld [vmem:[#allocation6 + $0xe60] sm:$0xff] }
  0xe1   :  { %1173 = vmatpush.msra.mxu2 %v481_v47  ;;  %1192 = vmatpush.msra.mxu3 %v498_v48  ;;  %v531_v47 = vld [vmem:[#allocation6 + $0xee8] sm:$0xff]  ;;  %v546_v48 = vld [vmem:[#allocation6 + $0xf60] sm:$0xff] }
  0xe2   :  { %1134 = vmatpush.msra.mxu0 %v448_v49  ;;  %1153 = vmatpush.msra.mxu1 %v465_v50  ;;  %v563_v49 = vld [vmem:[#allocation6 + $0xfe8] sm:$0xff]  ;;  %v513_v50 = vld [vmem:[#allocation6 + $0xe58] sm:$0xff] }
  0xe3   :  { %1174 = vmatpush.msra.mxu2 %v480_v51  ;;  %1193 = vmatpush.msra.mxu3 %v497_v52  ;;  %v530_v51 = vld [vmem:[#allocation6 + $0xee0] sm:$0xff]  ;;  %v545_v52 = vld [vmem:[#allocation6 + $0xf58] sm:$0xff] }
  0xe4   :  { %1135 = vmatpush.msra.mxu0 %v447_v53  ;;  %1154 = vmatpush.msra.mxu1 %v464_v54  ;;  %v562_v53 = vld [vmem:[#allocation6 + $0xfe0] sm:$0xff]  ;;  %v512_v54 = vld [vmem:[#allocation6 + $0xe50] sm:$0xff] }
  0xe5   :  { %1175 = vmatpush.msra.mxu2 %v479_v55  ;;  %1194 = vmatpush.msra.mxu3 %v496_v56  ;;  %v529_v55 = vld [vmem:[#allocation6 + $0xed8] sm:$0xff]  ;;  %v544_v56 = vld [vmem:[#allocation6 + $0xf50] sm:$0xff] }
  0xe6   :  { %1136 = vmatpush.msra.mxu0 %v446_v57  ;;  %1155 = vmatpush.msra.mxu1 %v463_v58  ;;  %v561_v57 = vld [vmem:[#allocation6 + $0xfd8] sm:$0xff]  ;;  %v511_v58 = vld [vmem:[#allocation6 + $0xe48] sm:$0xff] }
  0xe7   :  { %1176 = vmatpush.msra.mxu2 %v478_v59  ;;  %1195 = vmatpush.msra.mxu3 %v495_v60  ;;  %v528_v59 = vld [vmem:[#allocation6 + $0xed0] sm:$0xff]  ;;  %v543_v60 = vld [vmem:[#allocation6 + $0xf48] sm:$0xff] }
  0xe8   :  { %1137 = vmatpush.msra.mxu0 %v445_v61  ;;  %1156 = vmatpush.msra.mxu1 %v462_v62  ;;  %v560_v61 = vld [vmem:[#allocation6 + $0xfd0] sm:$0xff]  ;;  %v510_v62 = vld [vmem:[#allocation6 + $0xe40] sm:$0xff] }
  0xe9   :  { %1177 = vmatpush.msra.mxu2 %v477_v63  ;;  %1196 = vmatpush.msra.mxu3 %v494_v0  ;;  %v527_v63 = vld [vmem:[#allocation6 + $0xec8] sm:$0xff]  ;;  %v542_v0 = vld [vmem:[#allocation6 + $0xf40] sm:$0xff] }
  0xea   :  { %1138 = vmatpush.msra.mxu0 %v444_v1  ;;  %1157 = vmatpush.msra.mxu1 %v461_v2  ;;  %v559_v1 = vld [vmem:[#allocation6 + $0xfc8] sm:$0xff]  ;;  %v509_v2 = vld [vmem:[#allocation6 + $0xe38] sm:$0xff] }
  0xeb   :  { %1178 = vmatpush.msra.mxu2 %v476_v3  ;;  %1197 = vmatpush.msra.mxu3 %v493_v4  ;;  %v526_v3 = vld [vmem:[#allocation6 + $0xec0] sm:$0xff]  ;;  %v541_v4 = vld [vmem:[#allocation6 + $0xf38] sm:$0xff] }
  0xec   :  { %1139 = vmatpush.msra.mxu0 %v443_v5  ;;  %1158 = vmatpush.msra.mxu1 %v460_v6  ;;  %v558_v5 = vld [vmem:[#allocation6 + $0xfc0] sm:$0xff]  ;;  %v508_v6 = vld [vmem:[#allocation6 + $0xe30] sm:$0xff] }
  0xed   :  { %1179 = vmatpush.msra.mxu2 %v475_v7  ;;  %1198 = vmatpush.msra.mxu3 %v492_v8  ;;  %v525_v7 = vld [vmem:[#allocation6 + $0xeb8] sm:$0xff]  ;;  %v540_v8 = vld [vmem:[#allocation6 + $0xf30] sm:$0xff] }
  0xee   :  { %1140 = vmatpush.msra.mxu0 %v442_v9  ;;  %1159 = vmatpush.msra.mxu1 %v459_v10  ;;  %v557_v9 = vld [vmem:[#allocation6 + $0xfb8] sm:$0xff]  ;;  %v507_v10 = vld [vmem:[#allocation6 + $0xe28] sm:$0xff] }
  0xef   :  { %1180 = vmatpush.msra.mxu2 %v474_v11  ;;  %1199 = vmatpush.msra.mxu3 %v491_v12  ;;  %v524_v11 = vld [vmem:[#allocation6 + $0xeb0] sm:$0xff]  ;;  %v539_v12 = vld [vmem:[#allocation6 + $0xf28] sm:$0xff] }
  0xf0   :  { %1141 = vmatpush.msra.mxu0 %v441_v13  ;;  %1160 = vmatpush.msra.mxu1 %v458_v14  ;;  %v556_v13 = vld [vmem:[#allocation6 + $0xfb0] sm:$0xff]  ;;  %v506_v14 = vld [vmem:[#allocation6 + $0xe20] sm:$0xff] }
  0xf1   :  { %1181 = vmatpush.msra.mxu2 %v473_v15  ;;  %1200 = vmatpush.msra.mxu3 %v490_v16  ;;  %v523_v15 = vld [vmem:[#allocation6 + $0xea8] sm:$0xff]  ;;  %v538_v16 = vld [vmem:[#allocation6 + $0xf20] sm:$0xff] }
  0xf2   :  { %1142 = vmatpush.msra.mxu0 %v440_v17  ;;  %1161 = vmatpush.msra.mxu1 %v457_v18  ;;  %v555_v17 = vld [vmem:[#allocation6 + $0xfa8] sm:$0xff]  ;;  %v505_v18 = vld [vmem:[#allocation6 + $0xe18] sm:$0xff] }
  0xf3   :  { %1182 = vmatpush.msra.mxu2 %v472_v19  ;;  %1201 = vmatpush.msra.mxu3 %v489_v20  ;;  %v522_v19 = vld [vmem:[#allocation6 + $0xea0] sm:$0xff]  ;;  %v537_v20 = vld [vmem:[#allocation6 + $0xf18] sm:$0xff] }
  0xf4   :  { %1143 = vmatpush.msra.mxu0 %v439_v21  ;;  %1162 = vmatpush.msra.mxu1 %v456_v22  ;;  %v554_v21 = vld [vmem:[#allocation6 + $0xfa0] sm:$0xff]  ;;  %v504_v22 = vld [vmem:[#allocation6 + $0xe10] sm:$0xff] }
  0xf5   :  { %1183 = vmatpush.msra.mxu2 %v471_v24  ;;  %1202 = vmatpush.msra.mxu3 %v488_v25  ;;  %v536_v24 = vld [vmem:[#allocation6 + $0xf10] sm:$0xff]  ;;  %v553_v25 = vld [vmem:[#allocation6 + $0xf98] sm:$0xff] }
  0xf6   :  { %1144 = vmatpush.msra.mxu0 %v438_v29  ;;  %1163 = vmatpush.msra.mxu1 %v455_v30  ;;  %v503_v29 = vld [vmem:[#allocation6 + $0xe08] sm:$0xff]  ;;  %v520_v30 = vld [vmem:[#allocation6 + $0xe90] sm:$0xff] }
  0xf7   :  { %1184 = vmatpush.msra.mxu2 %v470_v33  ;;  %1203 = vmatpush.msra.mxu3 %v487_v34  ;;  %v535_v33 = vld [vmem:[#allocation6 + $0xf08] sm:$0xff]  ;;  %v552_v34 = vld [vmem:[#allocation6 + $0xf90] sm:$0xff] }
  0xf8   :  { %1145 = vmatmul.f32.vlgmr.msra.gmra.mxu0 %v609_v28  ;;  %1185 = vmatmul.f32.vlgmr.msra.gmra.mxu2 %v611_v26  ;;  %v502_v28 = vld [vmem:[#allocation6 + $0xe00] sm:$0xff]  ;;  %v519_v26 = vld [vmem:[#allocation6 + $0xe88] sm:$0xff] }
  0xf9   :  { %1209 = vmatpush.msrb.mxu0 %v517_v27  ;;  %1249 = vmatpush.msrb.mxu2 %v549_v31  ;;  %v534_v27 = vld [vmem:[#allocation6 + $0xf00] sm:$0xff]  ;;  %v551_v31 = vld [vmem:[#allocation6 + $0xf88] sm:$0xff] }
  0xfa   :  { %1164 = vmatpush.msra.mxu1 %v454_v36  ;;  %1204 = vmatpush.msra.mxu3 %v486_v37  ;;  %v613_v36 = vld.sshfl [vmem:[#allocation1 + $0x20] sm:$0xff pattern:$0x73625140]  ;;  %v615_v37 = vld.sshfl [vmem:[#allocation1 + $0x30] sm:$0xff pattern:$0x73625140] }
  0xfb   :  { %1165 = vmatmul.f32.vlgmr.msra.gmra.mxu1 %v610_v38  ;;  %1205 = vmatmul.f32.vlgmr.msra.gmra.mxu3 %v612_v32  ;;  %v518_v38 = vld [vmem:[#allocation6 + $0xe80] sm:$0xff] }
  0xfc   :  { %1210 = vmatpush.msrb.mxu0 %v516_v35  ;;  %1229 = vmatpush.msrb.mxu1 %v533_v39  ;;  %v550_v32 = vld [vmem:[#allocation6 + $0xf80] sm:$0xff]  ;;  %v616_v39 = vld.sshfl [vmem:[#allocation1 + $0x38] sm:$0xff pattern:$0x73625140] }
  0xfd   :  { %1250 = vmatpush.msrb.mxu2 %v548_v40  ;;  %1269 = vmatpush.msrb.mxu3 %v565_v41  ;;  %v614_v35 = vld.sshfl [vmem:[#allocation1 + $0x28] sm:$0xff pattern:$0x73625140]  ;;  %v567_v40 = vstv %s1496_s2  ;;  %v666_v41 = vpop.f32.mrf.mxu0  ;;  %s1419_s2 = smov [#allocation8]  }
  0xfe   :  { %1211 = vmatpush.msrb.mxu0 %v515_v42  ;;  %1230 = vmatpush.msrb.mxu1 %v532_v43  ;;  %v667_v42 = vadd.f32 %v666_v41, %v567_v40  ;;  %v686_v43 = vpop.f32.mrf.mxu1  ;;  %s1314_s24 = sshll.u32 %s1419_s2, 4  ;;  %s1315_s24 = int_to_ptr.vmem [resolvable:$true] %s1314_s24 }
  0xff   :  { %1251 = vmatpush.msrb.mxu2 %v547_v44  ;;  %1270 = vmatpush.msrb.mxu3 %v564_v45  ;;  %v706_v45 = vpop.f32.mrf.mxu2 }
 0x100   :  { %1212 = vmatpush.msrb.mxu0 %v514_v46  ;;  %1231 = vmatpush.msrb.mxu1 %v531_v47  ;;  %v687_v44 = vadd.f32 %v686_v43, %v667_v42  ;;  %v726_v47 = vpop.f32.mrf.mxu3 }
 0x101   :  { %1252 = vmatpush.msrb.mxu2 %v546_v48  ;;  %1271 = vmatpush.msrb.mxu3 %v563_v49 }
 0x102   :  { %1213 = vmatpush.msrb.mxu0 %v513_v50  ;;  %1232 = vmatpush.msrb.mxu1 %v530_v51  ;;  %v707_v46 = vadd.f32 %v706_v45, %v687_v44 }
 0x103   :  { %1253 = vmatpush.msrb.mxu2 %v545_v52  ;;  %1272 = vmatpush.msrb.mxu3 %v562_v53 }
 0x104   :  { %1214 = vmatpush.msrb.mxu0 %v512_v54  ;;  %1233 = vmatpush.msrb.mxu1 %v529_v55  ;;  %v727_v48 = vadd.f32 %v726_v47, %v707_v46 }
 0x105   :  { %1254 = vmatpush.msrb.mxu2 %v544_v56  ;;  %1273 = vmatpush.msrb.mxu3 %v561_v57  ;;  %v746_v49 = vpop.f32.mrf.mxu0 }
 0x106   :  { %1215 = vmatpush.msrb.mxu0 %v511_v58  ;;  %1234 = vmatpush.msrb.mxu1 %v528_v59  ;;  %v747_v50 = vadd.f32 %v746_v49, %v727_v48  ;;  %v766_v51 = vpop.f32.mrf.mxu1 }
 0x107   :  { %1255 = vmatpush.msrb.mxu2 %v543_v60  ;;  %1274 = vmatpush.msrb.mxu3 %v560_v61  ;;  %v786_v53 = vpop.f32.mrf.mxu2 }
 0x108   :  { %1216 = vmatpush.msrb.mxu0 %v510_v62  ;;  %1235 = vmatpush.msrb.mxu1 %v527_v63  ;;  %v767_v52 = vadd.f32 %v766_v51, %v747_v50  ;;  %v806_v55 = vpop.f32.mrf.mxu3 }
 0x109   :  { %1256 = vmatpush.msrb.mxu2 %v542_v0  ;;  %1275 = vmatpush.msrb.mxu3 %v559_v1 }
 0x10a   :  { %1217 = vmatpush.msrb.mxu0 %v509_v2  ;;  %1236 = vmatpush.msrb.mxu1 %v526_v3  ;;  %v787_v54 = vadd.f32 %v786_v53, %v767_v52 }
 0x10b   :  { %1257 = vmatpush.msrb.mxu2 %v541_v4  ;;  %1276 = vmatpush.msrb.mxu3 %v558_v5 }
 0x10c   :  { %1218 = vmatpush.msrb.mxu0 %v508_v6  ;;  %1237 = vmatpush.msrb.mxu1 %v525_v7  ;;  %v807_v57 = vadd.f32 %v806_v55, %v787_v54 }
 0x10d   :  { %1258 = vmatpush.msrb.mxu2 %v540_v8  ;;  %1277 = vmatpush.msrb.mxu3 %v557_v9  ;;  %v826_v56 = vpop.f32.mrf.mxu0 }
 0x10e   :  { %1219 = vmatpush.msrb.mxu0 %v507_v10  ;;  %1238 = vmatpush.msrb.mxu1 %v524_v11  ;;  %v827_v58 = vadd.f32 %v826_v56, %v807_v57  ;;  %v846_v59 = vpop.f32.mrf.mxu1 }
 0x10f   :  { %1259 = vmatpush.msrb.mxu2 %v539_v12  ;;  %1278 = vmatpush.msrb.mxu3 %v556_v13  ;;  %v866_v60 = vpop.f32.mrf.mxu2 }
 0x110   :  { %1220 = vmatpush.msrb.mxu0 %v506_v14  ;;  %1239 = vmatpush.msrb.mxu1 %v523_v15  ;;  %v847_v61 = vadd.f32 %v846_v59, %v827_v58  ;;  %v886_v63 = vpop.f32.mrf.mxu3 }
 0x111   :  { %1260 = vmatpush.msrb.mxu2 %v538_v16  ;;  %1279 = vmatpush.msrb.mxu3 %v555_v17 }
 0x112   :  { %1221 = vmatpush.msrb.mxu0 %v505_v18  ;;  %1240 = vmatpush.msrb.mxu1 %v522_v19  ;;  %v867_v62 = vadd.f32 %v866_v60, %v847_v61 }
 0x113   :  { %1261 = vmatpush.msrb.mxu2 %v537_v20  ;;  %1280 = vmatpush.msrb.mxu3 %v554_v21 }
 0x114   :  { %1222 = vmatpush.msrb.mxu0 %v504_v22  ;;  %1241 = vmatpush.msrb.mxu1 %v521_v23  ;;  %v887_v1 = vadd.f32 %v886_v63, %v867_v62 }
 0x115   :  { %1262 = vmatpush.msrb.mxu2 %v536_v24  ;;  %1281 = vmatpush.msrb.mxu3 %v553_v25  ;;  %v906_v0 = vpop.f32.mrf.mxu0 }
 0x116   :  { %1223 = vmatpush.msrb.mxu0 %v503_v29  ;;  %1242 = vmatpush.msrb.mxu1 %v520_v30  ;;  %v907_v2 = vadd.f32 %v906_v0, %v887_v1  ;;  %v926_v3 = vpop.f32.mrf.mxu1 }
 0x117   :  { %1263 = vmatpush.msrb.mxu2 %v535_v33  ;;  %1282 = vmatpush.msrb.mxu3 %v552_v34  ;;  %v946_v4 = vpop.f32.mrf.mxu2 }
 0x118   :  { %1224 = vmatpush.msrb.mxu0 %v502_v28  ;;  %1243 = vmatpush.msrb.mxu1 %v519_v26  ;;  %v927_v5 = vadd.f32 %v926_v3, %v907_v2  ;;  %v966_v7 = vpop.f32.mrf.mxu3 }
 0x119   :  { %1264 = vmatpush.msrb.mxu2 %v534_v27  ;;  %1283 = vmatpush.msrb.mxu3 %v551_v31 }
 0x11a   :  { %1225 = vmatmul.f32.vlgmr.msrb.gmra.mxu0 %v613_v36  ;;  %1265 = vmatmul.f32.vlgmr.msrb.gmra.mxu2 %v615_v37  ;;  %v947_v6 = vadd.f32 %v946_v4, %v927_v5 }
 0x11b   :  { %1244 = vmatpush.msrb.mxu1 %v518_v38  ;;  %1284 = vmatpush.msrb.mxu3 %v550_v32 }
 0x11c   :  { %1245 = vmatmul.f32.vlgmr.msrb.gmra.mxu1 %v614_v35  ;;  %1285 = vmatmul.f32.vlgmr.msrb.gmra.mxu3 %v616_v39  ;;  %v967_v9 = vadd.f32 %v966_v7, %v947_v6 }
 0x131   :  { %v986_v8 = vpop.f32.mrf.mxu0 }
 0x132   :  { %v987_v10 = vadd.f32 %v986_v8, %v967_v9 }
 0x134   :  { %v1006_v11 = vpop.f32.mrf.mxu1 }
 0x135   :  { %v1007_v13 = vadd.f32 %v1006_v11, %v987_v10 }
 0x137   :  { %v1026_v12 = vpop.f32.mrf.mxu2 }
 0x138   :  { %v1027_v14 = vadd.f32 %v1026_v12, %v1007_v13 }
 0x13a   :  { %v1046_v15 = vpop.f32.mrf.mxu3 }
 0x13b   :  { %v1047_v17 = vadd.f32 %v1046_v15, %v1027_v14 }
 0x153   :  { %v1066_v16 = vpop.f32.mrf.mxu0 }
 0x154   :  { %v1067_v18 = vadd.f32 %v1066_v16, %v1047_v17 }
 0x156   :  { %v1086_v19 = vpop.f32.mrf.mxu1 }
 0x157   :  { %v1087_v21 = vadd.f32 %v1086_v19, %v1067_v18 }
 0x159   :  { %v1106_v20 = vpop.f32.mrf.mxu2 }
 0x15a   :  { %v1107_v22 = vadd.f32 %v1106_v20, %v1087_v21 }
 0x15c   :  { %v1126_v23 = vpop.f32.mrf.mxu3 }
 0x15d   :  { %v1127_v25 = vadd.f32 %v1126_v23, %v1107_v22 }
 0x175   :  { %v1146_v24 = vpop.f32.mrf.mxu0 }
 0x176   :  { %v1147_v29 = vadd.f32 %v1146_v24, %v1127_v25 }
 0x178   :  { %v1166_v30 = vpop.f32.mrf.mxu1 }
 0x179   :  { %v1167_v34 = vadd.f32 %v1166_v30, %v1147_v29 }
 0x17b   :  { %v1186_v33 = vpop.f32.mrf.mxu2 }
 0x17c   :  { %v1187_v28 = vadd.f32 %v1186_v33, %v1167_v34 }
 0x17e   :  { %v1206_v26 = vpop.f32.mrf.mxu3 }
 0x17f   :  { %v1207_v27 = vadd.f32 %v1206_v26, %v1187_v28 }
 0x197   :  { %v1226_v31 = vpop.f32.mrf.mxu0 }
 0x198   :  { %v1227_v36 = vadd.f32 %v1226_v31, %v1207_v27 }
 0x199   :  { %v1246_v37 = vpop.f32.mrf.mxu1 }
 0x19a   :  { %v1247_v38 = vadd.f32 %v1246_v37, %v1227_v36 }
 0x19d   :  { %v1266_v32 = vpop.f32.mrf.mxu2 }
 0x19e   :  { %v1267_v35 = vadd.f32 %v1266_v32, %v1247_v38 }
 0x19f   :  { %v1286_v39 = vpop.f32.mrf.mxu3 }
 0x1a0   :  { %v1287_v40 = vadd.f32 %v1286_v39, %v1267_v35 }
 0x1a2   :  { %v1327_v41 = vmul.f32 -1.442695, %v1287_v40 }
 0x1a4   :  { %1333 = vpow2.f32 %v1327_v41 }
 0x1aa   :  { %v1334_v42 = vpop.eup %1333 }
 0x1ab   :  { %v1292_v43 = vadd.f32 1.0, %v1334_v42 }
 0x1ad   :  { %1335 = vrcp.f32 %v1292_v43  ;;  %v1304_v47 = vand.u32 2147483648, %v1292_v43  ;;  %v1302_v49 = vand.u32 2147483647, %v1292_v43  ;;  %vm1298_vm1 = vweird.f32 %v1292_v43 }
 0x1af   :  { %v1305_v51 = vor.u32 1.1754944e-38, %v1304_v47  ;;  %vm1303_vm3 = vcmp.eq.f32.partialorder %v1302_v49, 8.507059e+37 }
 0x1b3   :  { %v1336_v44 = vpop.eup %1335 }
 0x1b4   :  { %v1294_v45 = vmul.f32 %v1336_v44, %v1292_v43  ;;  %vm1299_vm0 = vweird.f32 %v1336_v44 }
 0x1b5   :  { %vm1300_vm2 = vmor %vm1298_vm1, %vm1299_vm0 }
 0x1b6   :  { %v1295_v46 = vsub.f32 1.0, %v1294_v45 }
 0x1b8   :  { %v1296_v48 = vmul.f32 %v1336_v44, %v1295_v46 }
 0x1ba   :  { %v1297_v50 = vadd.f32 %v1336_v44, %v1296_v48 }
 0x1bc   :  { %v1301_v52 = vsel %vm1300_vm2, %v1336_v44, %v1297_v50 }
 0x1bd   :  { %v1306_v53 = vsel %vm1303_vm3, %v1305_v51, %v1301_v52 }
 0x1be   :  { %1308 = vst [vmem:[#allocation8] sm:$0x3] %v1306_v53 }
 0x1bf   :  { %1319 = dma.vmem_to_hbm [thread:$0]  %s1315_s24, 32, %s1317_s27, [#allocation5]  }
 0x1c0   :  { %1413 = dma.done.wait [#allocation5], 32  }
 0x1c1   :  { %1414 = vsyncadd [#allocation5], 4294967264 }
 0x1c2   :  { %1324 = vsyncpa [#allocation4], 1 }
 0x1c3   :  { %1325 = vsyncpa [#allocation7], 1 }
 0x1c4   :  { %1326 = vsyncpa [#allocation5], 1 }

</bundles_post_ra>
